<compile_context>
chip_gen: v5e
topology: v5e:2x2
jax: 0.10.0
libtpu: 0.0.40
codegen_flags: <defaults>
</compile_context>

<pallas_src>
import jax
import jax.numpy as jnp
from jax.experimental import pallas as pl
from jax.experimental.pallas import tpu as pltpu


SCALES = (("slow", 1.25), ("normal", 1.0), ("fast", 0.75))
KSIZE = 7
HALF_K = KSIZE // 2
OUT_ROWS = 8                 # final conv channels (2) zero-padded to a dense sublane tile


# ----------------------------------------------------------------------------
# Pallas kernel: one grid step == one branch (all batch elements lane-packed).
# ----------------------------------------------------------------------------
def _decoder_kernel(x_ref, valid_ref, wmean_ref, w1_ref, b1_ref,
                    wm_ref, bm_ref, w7_ref, b7_ref, out_ref):
    # x_ref    : (1, C_in, N)     lane-packed subband input, N = B * stride
    # valid_ref: (1, 1, N)        1.0 on valid columns, 0.0 on inter-example halo
    # wmean_ref: (1, N, lanes)    normalized masked-mean weights (mask/msum, block-diag per example)
    # w1_ref   : (1, H, C_in)     1x1 conv                    b1_ref: (1, H, 1)
    # wm_ref   : (1, L, H, 7*H)   k=7 convs, im2col layout    bm_ref: (1, L, H, 1)
    # w7_ref   : (1, 8, H)        final 1x1 conv (channels zero-padded 2 -> 8)
    # out_ref  : (1, 8, lanes)    rows 0/1 = [attn_mean, wmark_mean] per batch lane
    N = x_ref.shape[-1]
    H = w1_ref.shape[1]
    x = x_ref[0]                                             # (C_in, N)
    valid = valid_ref[0]                                     # (1, N)

    # layer 0: 1x1 conv + ReLU
    # TODO(synk): `Conv` class not in the snippet; assumed Conv1d('same') + ReLU,
    #             act=False on the final layer.
    h = jnp.dot(w1_ref[0], x, preferred_element_type=jnp.float32) + b1_ref[0]
    h = jnp.maximum(h, 0.0) * valid        # re-zero halo columns -> exact 'same' zero padding

    zeros_halo = jnp.zeros((H, HALF_K), dtype=h.dtype)
    n_mid = wm_ref.shape[1]
    for l in range(n_mid):
        # im2col: 'same'-pad h, stack the 7 shifted views along channels, one matmul.
        hp = jnp.concatenate([zeros_halo, h, zeros_halo], axis=1)                # (H, N+6)
        stacked = jnp.concatenate([hp[:, k:k + N] for k in range(KSIZE)], axis=0)  # (7H, N)
        h = jnp.dot(wm_ref[0, l], stacked,
                    preferred_element_type=jnp.float32) + bm_ref[0, l]
        h = jnp.maximum(h, 0.0) * valid

    # final 1x1 conv (no activation); channels padded to 8 dense rows
    out = jnp.dot(w7_ref[0], h, preferred_element_type=jnp.float32) + b7_ref[0]  # (8, N)

    # masked mean over time folded into one lane-dense matmul:
    #   mm[c, b] = sum_t out[c, t_b] * m_b[t] / sum_t m_b[t]
    out_ref[0] = jnp.dot(out, wmean_ref[0], preferred_element_type=jnp.float32)  # (8, lanes)


# ----------------------------------------------------------------------------
# Glue (plain JAX): mask, interpolation, lane-packing, softmax combine.
# ----------------------------------------------------------------------------
def magmask(magspec, thresh=0.5):
    # TODO(synk): magmask() is not in the provided snippet; approximated as a
    # per-frame mean-magnitude threshold (detached / no-grad in the original).
    return (jnp.mean(magspec, axis=1) > thresh).astype(magspec.dtype)       # (B, T)


def lerp(x, size):
    """F.interpolate(mode='linear', align_corners=True) along the last axis."""
    T = x.shape[-1]
    pos = jnp.arange(size, dtype=jnp.float32) * ((T - 1) / max(size - 1, 1))
    lo = jnp.floor(pos).astype(jnp.int32)
    hi = jnp.minimum(lo + 1, T - 1)
    w = pos - lo.astype(jnp.float32)
    return x[..., lo] * (1.0 - w) + x[..., hi] * w


def nerp(x, size):
    """F.interpolate(mode='nearest') along the last axis."""
    T = x.shape[-1]
    idx = jnp.clip((jnp.arange(size, dtype=jnp.float32) * (T / size)).astype(jnp.int32),
                   0, T - 1)
    return x[..., idx]


def _pack_branches(magspec, subband):
    """Lane-pack all batch elements of each branch into one (C, B*stride) operand."""
    mask = magmask(magspec)[:, None, :]                      # (B, 1, T)
    sb = magspec[:, :subband, :]                             # (B, C, T)
    B, C, T = sb.shape
    tbs = [int(T * s) for _, s in SCALES]
    stride = max(tbs) + 2 * HALF_K + 2                       # >=3-column zero halo per example
    N = B * stride
    lanes = ((B + 127) // 128) * 128                         # dense output lanes

    xs, valids, wmeans = [], [], []
    for (name, _), tb in zip(SCALES, tbs):
        xb = sb if name == "normal" else lerp(sb, tb)                        # (B, C, tb)
        xb = jnp.pad(xb, ((0, 0), (0, 0), (0, stride - tb)))                 # (B, C, stride)
        xs.append(jnp.transpose(xb, (1, 0, 2)).reshape(C, N))                # (C, N)

        v = (jnp.arange(stride) < tb).astype(jnp.float32)                    # (stride,)
        valids.append(jnp.tile(v, B)[None, :])                               # (1, N)

        mb = nerp(mask, tb)[:, 0, :]                                         # (B, tb)
        mb = jnp.pad(mb, ((0, 0), (0, stride - tb)))                         # (B, stride)
        # NOTE: like the PyTorch module, an all-zero mask would divide by zero.
        w = mb / jnp.sum(mb, axis=1, keepdims=True)
        wmat = w[:, :, None] * jnp.eye(B, dtype=jnp.float32)[:, None, :]     # (B, stride, B)
        wmat = wmat.reshape(N, B)
        wmeans.append(jnp.pad(wmat, ((0, 0), (0, lanes - B))))               # (N, lanes)

    return jnp.stack(xs), jnp.stack(valids), jnp.stack(wmeans), B, lanes


def decoder_forward(magspec, params, subband):
    """Pallas path: 3 branches x lane-packed batch in a single pallas_call."""
    x_all, valid_all, wmean_all, B, lanes = _pack_branches(magspec, subband)
    nb, C, N = x_all.shape
    H = params["slow"]["w1"].shape[0]
    L = params["slow"]["wm"].shape[0]

    def stack(key):
        return jnp.stack([params[name][key] for name, _ in SCALES])

    w1, b1 = stack("w1"), stack("b1")                                        # (3,H,C), (3,H,1)
    wm = stack("wm")                                                         # (3,L,7,H,H)
    wm_cat = jnp.concatenate([wm[:, :, k] for k in range(KSIZE)], axis=-1)   # (3,L,H,7H)
    bm = stack("bm")                                                         # (3,L,H,1)
    w7 = jnp.pad(stack("w7"), ((0, 0), (0, OUT_ROWS - 2), (0, 0)))           # (3,8,H)
    b7 = jnp.pad(stack("b7"), ((0, 0), (0, OUT_ROWS - 2), (0, 0)))           # (3,8,1)

    out = pl.pallas_call(
        _decoder_kernel,
        out_shape=jax.ShapeDtypeStruct((nb, OUT_ROWS, lanes), jnp.float32),
        grid=(nb,),
        in_specs=[
            pl.BlockSpec((1, C, N), lambda b: (b, 0, 0)),
            pl.BlockSpec((1, 1, N), lambda b: (b, 0, 0)),
            pl.BlockSpec((1, N, lanes), lambda b: (b, 0, 0)),
            pl.BlockSpec((1, H, C), lambda b: (b, 0, 0)),
            pl.BlockSpec((1, H, 1), lambda b: (b, 0, 0)),
            pl.BlockSpec((1, L, H, KSIZE * H), lambda b: (b, 0, 0, 0)),
            pl.BlockSpec((1, L, H, 1), lambda b: (b, 0, 0, 0)),
            pl.BlockSpec((1, OUT_ROWS, H), lambda b: (b, 0, 0)),
            pl.BlockSpec((1, OUT_ROWS, 1), lambda b: (b, 0, 0)),
        ],
        out_specs=pl.BlockSpec((1, OUT_ROWS, lanes), lambda b: (b, 0, 0)),
        compiler_params=pltpu.CompilerParams(dimension_semantics=("parallel",)),
    )(x_all, valid_all, wmean_all, w1, b1, wm_cat, bm, w7, b7)

    attn = jax.nn.softmax(out[:, 0, :B], axis=0)             # (3, B) softmax over branches
    return jnp.sum(out[:, 1, :B] * attn, axis=0)             # (B,)


# ----------------------------------------------------------------------------
# Pure-JAX reference (mirrors the PyTorch forward), used as a correctness check.
# ----------------------------------------------------------------------------
def _ref_layers(x, p):
    T = x.shape[-1]
    h = jnp.einsum("oc,bct->bot", p["w1"], x) + p["b1"][None]
    h = jnp.maximum(h, 0.0)
    for l in range(p["wm"].shape[0]):
        hp = jnp.pad(h, ((0, 0), (0, 0), (HALF_K, HALF_K)))
        acc = jnp.zeros_like(h)
        for k in range(KSIZE):
            acc = acc + jnp.einsum("oc,bct->bot", p["wm"][l, k], hp[:, :, k:k + T])
        h = jnp.maximum(acc + p["bm"][l][None], 0.0)
    return jnp.einsum("oc,bct->bot", p["w7"], h) + p["b7"][None]             # (B, 2, T)


def decoder_forward_ref(magspec, params, subband):
    mask = magmask(magspec)[:, None, :]
    sb = magspec[:, :subband, :]
    _, _, T = sb.shape
    attns, wms = [], []
    for name, s in SCALES:
        tb = int(T * s)
        xb = sb if name == "normal" else lerp(sb, tb)
        o = _ref_layers(xb, params[name])                                    # (B, 2, tb)
        mb = nerp(mask, tb)                                                  # (B, 1, tb)
        mm = jnp.sum(o * mb, axis=2) / jnp.sum(mb, axis=2)                   # (B, 2)
        attns.append(mm[:, 0])
        wms.append(mm[:, 1])
    attn = jax.nn.softmax(jnp.stack(attns, axis=1), axis=1)                  # (B, 3)
    return jnp.sum(jnp.stack(wms, axis=1) * attn, axis=1)                    # (B,)


# ----------------------------------------------------------------------------
# Deterministic parameter init.
# ----------------------------------------------------------------------------
def init_branch(key, subband, hidden, n_mid=5, k=KSIZE):
    ks = jax.random.split(key, 10)

    def conv_w(kk, co, ci, kw):
        return jax.random.normal(kk, (co, ci, kw), jnp.float32) / jnp.sqrt(ci * kw)

    w1 = conv_w(ks[0], hidden, subband, 1)[:, :, 0]                          # (H, subband)
    b1 = 0.01 * jax.random.normal(ks[1], (hidden, 1), jnp.float32)
    wm = jnp.stack([conv_w(ks[2 + i], hidden, hidden, k) for i in range(n_mid)])
    wm = jnp.transpose(wm, (0, 3, 1, 2))                                     # (L, 7, H, H)
    bm = 0.01 * jax.random.normal(ks[7], (n_mid, hidden, 1), jnp.float32)
    w7 = conv_w(ks[8], 2, hidden, 1)[:, :, 0]                                # (2, H)
    b7 = 0.01 * jax.random.normal(ks[9], (2, 1), jnp.float32)
    return dict(w1=w1, b1=b1, wm=wm, bm=bm, w7=w7, b7=b7)


if __name__ == "__main__":
    B, FREQ, T = 2, 40, 16
    SUBBAND, HIDDEN = 32, 32

    key = jax.random.PRNGKey(0)
    k_in, k_s, k_n, k_f = jax.random.split(key, 4)
    magspec = jnp.abs(jax.random.normal(k_in, (B, FREQ, T), jnp.float32))

    params = {
        "slow": init_branch(k_s, SUBBAND, HIDDEN),
        "normal": init_branch(k_n, SUBBAND, HIDDEN),
        "fast": init_branch(k_f, SUBBAND, HIDDEN),
    }

    wmarks = jax.block_until_ready(decoder_forward(magspec, params, SUBBAND))
    wmarks_ref = jax.block_until_ready(decoder_forward_ref(magspec, params, SUBBAND))

    assert wmarks.shape == (B,)
    assert jnp.allclose(wmarks, wmarks_ref, atol=1e-3, rtol=1e-3), (wmarks, wmarks_ref)
    print("KERNEL_OK")
</pallas_src>

<mosaic_0001>
module attributes {stable_mosaic.version = 11 : i64} {
  func.func @_decoder_kernel(%arg0: i32, %arg1: memref<1x32x56xf32, #tpu.memory_space<vmem>>, %arg2: memref<1x1x56xf32, #tpu.memory_space<vmem>>, %arg3: memref<1x56x128xf32, #tpu.memory_space<vmem>>, %arg4: memref<1x32x32xf32, #tpu.memory_space<vmem>>, %arg5: memref<1x32x1xf32, #tpu.memory_space<vmem>>, %arg6: memref<1x5x32x224xf32, #tpu.memory_space<vmem>>, %arg7: memref<1x5x32x1xf32, #tpu.memory_space<vmem>>, %arg8: memref<1x8x32xf32, #tpu.memory_space<vmem>>, %arg9: memref<1x8x1xf32, #tpu.memory_space<vmem>>, %arg10: memref<1x8x128xf32, #tpu.memory_space<vmem>>) attributes {dimension_semantics = [#tpu.dimension_semantics<parallel>], iteration_bounds = array<i64: 3>, scalar_prefetch = 0 : i64, scratch_operands = 0 : i64, tpu.core_type = #tpu.core_type<tc>, window_params = [{transform_indices = @transform_0, window_bounds = array<i64: 1, 32, 56>}, {transform_indices = @transform_1, window_bounds = array<i64: 1, 1, 56>}, {transform_indices = @transform_2, window_bounds = array<i64: 1, 56, 128>}, {transform_indices = @transform_3, window_bounds = array<i64: 1, 32, 32>}, {transform_indices = @transform_4, window_bounds = array<i64: 1, 32, 1>}, {transform_indices = @transform_5, window_bounds = array<i64: 1, 5, 32, 224>}, {transform_indices = @transform_6, window_bounds = array<i64: 1, 5, 32, 1>}, {transform_indices = @transform_7, window_bounds = array<i64: 1, 8, 32>}, {transform_indices = @transform_8, window_bounds = array<i64: 1, 8, 1>}, {transform_indices = @transform_9, window_bounds = array<i64: 1, 8, 128>}]} {
    %c0 = arith.constant 0 : index
    %c0_0 = arith.constant 0 : index
    %c0_1 = arith.constant 0 : index
    %0 = vector.load %arg1[%c0, %c0_0, %c0_1] : memref<1x32x56xf32, #tpu.memory_space<vmem>>, vector<1x32x56xf32>
    %1 = vector.shape_cast %0 : vector<1x32x56xf32> to vector<32x56xf32>
    %c0_2 = arith.constant 0 : index
    %c0_3 = arith.constant 0 : index
    %c0_4 = arith.constant 0 : index
    %2 = vector.load %arg2[%c0_2, %c0_3, %c0_4] : memref<1x1x56xf32, #tpu.memory_space<vmem>>, vector<1x1x56xf32>
    %3 = vector.shape_cast %2 : vector<1x1x56xf32> to vector<1x56xf32>
    %c0_5 = arith.constant 0 : index
    %c0_6 = arith.constant 0 : index
    %c0_7 = arith.constant 0 : index
    %4 = vector.load %arg4[%c0_5, %c0_6, %c0_7] : memref<1x32x32xf32, #tpu.memory_space<vmem>>, vector<1x32x32xf32>
    %5 = vector.shape_cast %4 : vector<1x32x32xf32> to vector<32x32xf32>
    %cst = arith.constant dense<0.000000e+00> : vector<32x56xf32>
    %6 = tpu.matmul %5, %1, %cst {dimension_numbers = #tpu.dot_dimension_numbers<[1], [0], [0], [1], [0, 0, 1, 1], [], []>} : vector<32x32xf32>, vector<32x56xf32>, vector<32x56xf32> -> vector<32x56xf32>
    %c0_8 = arith.constant 0 : index
    %c0_9 = arith.constant 0 : index
    %c0_10 = arith.constant 0 : index
    %7 = vector.load %arg5[%c0_8, %c0_9, %c0_10] : memref<1x32x1xf32, #tpu.memory_space<vmem>>, vector<1x32x1xf32>
    %8 = vector.shape_cast %7 : vector<1x32x1xf32> to vector<32x1xf32>
    %9 = vector.broadcast %8 : vector<32x1xf32> to vector<32x56xf32>
    %10 = arith.addf %6, %9 : vector<32x56xf32>
    %cst_11 = arith.constant 0.000000e+00 : f32
    %11 = vector.broadcast %cst_11 : f32 to vector<32x56xf32>
    %12 = arith.maximumf %10, %11 : vector<32x56xf32>
    %13 = vector.broadcast %3 : vector<1x56xf32> to vector<32x56xf32>
    %14 = arith.mulf %12, %13 : vector<32x56xf32>
    %cst_12 = arith.constant 0.000000e+00 : f32
    %15 = vector.broadcast %cst_12 : f32 to vector<32x3xf32>
    %16 = tpu.concatenate %15, %14, %15 in 1 : vector<32x3xf32>, vector<32x56xf32>, vector<32x3xf32> -> vector<32x62xf32>
    %17 = vector.extract_strided_slice %16 {offsets = [0, 0], sizes = [32, 56], strides = [1, 1]} : vector<32x62xf32> to vector<32x56xf32>
    %18 = vector.extract_strided_slice %16 {offsets = [0, 1], sizes = [32, 56], strides = [1, 1]} : vector<32x62xf32> to vector<32x56xf32>
    %19 = vector.extract_strided_slice %16 {offsets = [0, 2], sizes = [32, 56], strides = [1, 1]} : vector<32x62xf32> to vector<32x56xf32>
    %20 = vector.extract_strided_slice %16 {offsets = [0, 3], sizes = [32, 56], strides = [1, 1]} : vector<32x62xf32> to vector<32x56xf32>
    %21 = vector.extract_strided_slice %16 {offsets = [0, 4], sizes = [32, 56], strides = [1, 1]} : vector<32x62xf32> to vector<32x56xf32>
    %22 = vector.extract_strided_slice %16 {offsets = [0, 5], sizes = [32, 56], strides = [1, 1]} : vector<32x62xf32> to vector<32x56xf32>
    %23 = vector.extract_strided_slice %16 {offsets = [0, 6], sizes = [32, 56], strides = [1, 1]} : vector<32x62xf32> to vector<32x56xf32>
    %24 = tpu.concatenate %17, %18, %19, %20, %21, %22, %23 in 0 : vector<32x56xf32>, vector<32x56xf32>, vector<32x56xf32>, vector<32x56xf32>, vector<32x56xf32>, vector<32x56xf32>, vector<32x56xf32> -> vector<224x56xf32>
    %c0_13 = arith.constant 0 : index
    %c0_14 = arith.constant 0 : index
    %c0_15 = arith.constant 0 : index
    %c0_16 = arith.constant 0 : index
    %25 = vector.load %arg6[%c0_13, %c0_14, %c0_15, %c0_16] : memref<1x5x32x224xf32, #tpu.memory_space<vmem>>, vector<1x1x32x224xf32>
    %26 = vector.shape_cast %25 : vector<1x1x32x224xf32> to vector<32x224xf32>
    %cst_17 = arith.constant dense<0.000000e+00> : vector<32x56xf32>
    %27 = tpu.matmul %26, %24, %cst_17 {dimension_numbers = #tpu.dot_dimension_numbers<[1], [0], [0], [1], [0, 0, 1, 1], [], []>} : vector<32x224xf32>, vector<224x56xf32>, vector<32x56xf32> -> vector<32x56xf32>
    %c0_18 = arith.constant 0 : index
    %c0_19 = arith.constant 0 : index
    %c0_20 = arith.constant 0 : index
    %c0_21 = arith.constant 0 : index
    %28 = vector.load %arg7[%c0_18, %c0_19, %c0_20, %c0_21] : memref<1x5x32x1xf32, #tpu.memory_space<vmem>>, vector<1x1x32x1xf32>
    %29 = vector.shape_cast %28 : vector<1x1x32x1xf32> to vector<32x1xf32>
    %30 = vector.broadcast %29 : vector<32x1xf32> to vector<32x56xf32>
    %31 = arith.addf %27, %30 : vector<32x56xf32>
    %cst_22 = arith.constant 0.000000e+00 : f32
    %32 = vector.broadcast %cst_22 : f32 to vector<32x56xf32>
    %33 = arith.maximumf %31, %32 : vector<32x56xf32>
    %34 = vector.broadcast %3 : vector<1x56xf32> to vector<32x56xf32>
    %35 = arith.mulf %33, %34 : vector<32x56xf32>
    %36 = tpu.concatenate %15, %35, %15 in 1 : vector<32x3xf32>, vector<32x56xf32>, vector<32x3xf32> -> vector<32x62xf32>
    %37 = vector.extract_strided_slice %36 {offsets = [0, 0], sizes = [32, 56], strides = [1, 1]} : vector<32x62xf32> to vector<32x56xf32>
    %38 = vector.extract_strided_slice %36 {offsets = [0, 1], sizes = [32, 56], strides = [1, 1]} : vector<32x62xf32> to vector<32x56xf32>
    %39 = vector.extract_strided_slice %36 {offsets = [0, 2], sizes = [32, 56], strides = [1, 1]} : vector<32x62xf32> to vector<32x56xf32>
    %40 = vector.extract_strided_slice %36 {offsets = [0, 3], sizes = [32, 56], strides = [1, 1]} : vector<32x62xf32> to vector<32x56xf32>
    %41 = vector.extract_strided_slice %36 {offsets = [0, 4], sizes = [32, 56], strides = [1, 1]} : vector<32x62xf32> to vector<32x56xf32>
    %42 = vector.extract_strided_slice %36 {offsets = [0, 5], sizes = [32, 56], strides = [1, 1]} : vector<32x62xf32> to vector<32x56xf32>
    %43 = vector.extract_strided_slice %36 {offsets = [0, 6], sizes = [32, 56], strides = [1, 1]} : vector<32x62xf32> to vector<32x56xf32>
    %44 = tpu.concatenate %37, %38, %39, %40, %41, %42, %43 in 0 : vector<32x56xf32>, vector<32x56xf32>, vector<32x56xf32>, vector<32x56xf32>, vector<32x56xf32>, vector<32x56xf32>, vector<32x56xf32> -> vector<224x56xf32>
    %c0_23 = arith.constant 0 : index
    %c1 = arith.constant 1 : index
    %c0_24 = arith.constant 0 : index
    %c0_25 = arith.constant 0 : index
    %45 = vector.load %arg6[%c0_23, %c1, %c0_24, %c0_25] : memref<1x5x32x224xf32, #tpu.memory_space<vmem>>, vector<1x1x32x224xf32>
    %46 = vector.shape_cast %45 : vector<1x1x32x224xf32> to vector<32x224xf32>
    %cst_26 = arith.constant dense<0.000000e+00> : vector<32x56xf32>
    %47 = tpu.matmul %46, %44, %cst_26 {dimension_numbers = #tpu.dot_dimension_numbers<[1], [0], [0], [1], [0, 0, 1, 1], [], []>} : vector<32x224xf32>, vector<224x56xf32>, vector<32x56xf32> -> vector<32x56xf32>
    %c0_27 = arith.constant 0 : index
    %c1_28 = arith.constant 1 : index
    %c0_29 = arith.constant 0 : index
    %c0_30 = arith.constant 0 : index
    %48 = vector.load %arg7[%c0_27, %c1_28, %c0_29, %c0_30] : memref<1x5x32x1xf32, #tpu.memory_space<vmem>>, vector<1x1x32x1xf32>
    %49 = vector.shape_cast %48 : vector<1x1x32x1xf32> to vector<32x1xf32>
    %50 = vector.broadcast %49 : vector<32x1xf32> to vector<32x56xf32>
    %51 = arith.addf %47, %50 : vector<32x56xf32>
    %cst_31 = arith.constant 0.000000e+00 : f32
    %52 = vector.broadcast %cst_31 : f32 to vector<32x56xf32>
    %53 = arith.maximumf %51, %52 : vector<32x56xf32>
    %54 = vector.broadcast %3 : vector<1x56xf32> to vector<32x56xf32>
    %55 = arith.mulf %53, %54 : vector<32x56xf32>
    %56 = tpu.concatenate %15, %55, %15 in 1 : vector<32x3xf32>, vector<32x56xf32>, vector<32x3xf32> -> vector<32x62xf32>
    %57 = vector.extract_strided_slice %56 {offsets = [0, 0], sizes = [32, 56], strides = [1, 1]} : vector<32x62xf32> to vector<32x56xf32>
    %58 = vector.extract_strided_slice %56 {offsets = [0, 1], sizes = [32, 56], strides = [1, 1]} : vector<32x62xf32> to vector<32x56xf32>
    %59 = vector.extract_strided_slice %56 {offsets = [0, 2], sizes = [32, 56], strides = [1, 1]} : vector<32x62xf32> to vector<32x56xf32>
    %60 = vector.extract_strided_slice %56 {offsets = [0, 3], sizes = [32, 56], strides = [1, 1]} : vector<32x62xf32> to vector<32x56xf32>
    %61 = vector.extract_strided_slice %56 {offsets = [0, 4], sizes = [32, 56], strides = [1, 1]} : vector<32x62xf32> to vector<32x56xf32>
    %62 = vector.extract_strided_slice %56 {offsets = [0, 5], sizes = [32, 56], strides = [1, 1]} : vector<32x62xf32> to vector<32x56xf32>
    %63 = vector.extract_strided_slice %56 {offsets = [0, 6], sizes = [32, 56], strides = [1, 1]} : vector<32x62xf32> to vector<32x56xf32>
    %64 = tpu.concatenate %57, %58, %59, %60, %61, %62, %63 in 0 : vector<32x56xf32>, vector<32x56xf32>, vector<32x56xf32>, vector<32x56xf32>, vector<32x56xf32>, vector<32x56xf32>, vector<32x56xf32> -> vector<224x56xf32>
    %c0_32 = arith.constant 0 : index
    %c2 = arith.constant 2 : index
    %c0_33 = arith.constant 0 : index
    %c0_34 = arith.constant 0 : index
    %65 = vector.load %arg6[%c0_32, %c2, %c0_33, %c0_34] : memref<1x5x32x224xf32, #tpu.memory_space<vmem>>, vector<1x1x32x224xf32>
    %66 = vector.shape_cast %65 : vector<1x1x32x224xf32> to vector<32x224xf32>
    %cst_35 = arith.constant dense<0.000000e+00> : vector<32x56xf32>
    %67 = tpu.matmul %66, %64, %cst_35 {dimension_numbers = #tpu.dot_dimension_numbers<[1], [0], [0], [1], [0, 0, 1, 1], [], []>} : vector<32x224xf32>, vector<224x56xf32>, vector<32x56xf32> -> vector<32x56xf32>
    %c0_36 = arith.constant 0 : index
    %c2_37 = arith.constant 2 : index
    %c0_38 = arith.constant 0 : index
    %c0_39 = arith.constant 0 : index
    %68 = vector.load %arg7[%c0_36, %c2_37, %c0_38, %c0_39] : memref<1x5x32x1xf32, #tpu.memory_space<vmem>>, vector<1x1x32x1xf32>
    %69 = vector.shape_cast %68 : vector<1x1x32x1xf32> to vector<32x1xf32>
    %70 = vector.broadcast %69 : vector<32x1xf32> to vector<32x56xf32>
    %71 = arith.addf %67, %70 : vector<32x56xf32>
    %cst_40 = arith.constant 0.000000e+00 : f32
    %72 = vector.broadcast %cst_40 : f32 to vector<32x56xf32>
    %73 = arith.maximumf %71, %72 : vector<32x56xf32>
    %74 = vector.broadcast %3 : vector<1x56xf32> to vector<32x56xf32>
    %75 = arith.mulf %73, %74 : vector<32x56xf32>
    %76 = tpu.concatenate %15, %75, %15 in 1 : vector<32x3xf32>, vector<32x56xf32>, vector<32x3xf32> -> vector<32x62xf32>
    %77 = vector.extract_strided_slice %76 {offsets = [0, 0], sizes = [32, 56], strides = [1, 1]} : vector<32x62xf32> to vector<32x56xf32>
    %78 = vector.extract_strided_slice %76 {offsets = [0, 1], sizes = [32, 56], strides = [1, 1]} : vector<32x62xf32> to vector<32x56xf32>
    %79 = vector.extract_strided_slice %76 {offsets = [0, 2], sizes = [32, 56], strides = [1, 1]} : vector<32x62xf32> to vector<32x56xf32>
    %80 = vector.extract_strided_slice %76 {offsets = [0, 3], sizes = [32, 56], strides = [1, 1]} : vector<32x62xf32> to vector<32x56xf32>
    %81 = vector.extract_strided_slice %76 {offsets = [0, 4], sizes = [32, 56], strides = [1, 1]} : vector<32x62xf32> to vector<32x56xf32>
    %82 = vector.extract_strided_slice %76 {offsets = [0, 5], sizes = [32, 56], strides = [1, 1]} : vector<32x62xf32> to vector<32x56xf32>
    %83 = vector.extract_strided_slice %76 {offsets = [0, 6], sizes = [32, 56], strides = [1, 1]} : vector<32x62xf32> to vector<32x56xf32>
    %84 = tpu.concatenate %77, %78, %79, %80, %81, %82, %83 in 0 : vector<32x56xf32>, vector<32x56xf32>, vector<32x56xf32>, vector<32x56xf32>, vector<32x56xf32>, vector<32x56xf32>, vector<32x56xf32> -> vector<224x56xf32>
    %c0_41 = arith.constant 0 : index
    %c3 = arith.constant 3 : index
    %c0_42 = arith.constant 0 : index
    %c0_43 = arith.constant 0 : index
    %85 = vector.load %arg6[%c0_41, %c3, %c0_42, %c0_43] : memref<1x5x32x224xf32, #tpu.memory_space<vmem>>, vector<1x1x32x224xf32>
    %86 = vector.shape_cast %85 : vector<1x1x32x224xf32> to vector<32x224xf32>
    %cst_44 = arith.constant dense<0.000000e+00> : vector<32x56xf32>
    %87 = tpu.matmul %86, %84, %cst_44 {dimension_numbers = #tpu.dot_dimension_numbers<[1], [0], [0], [1], [0, 0, 1, 1], [], []>} : vector<32x224xf32>, vector<224x56xf32>, vector<32x56xf32> -> vector<32x56xf32>
    %c0_45 = arith.constant 0 : index
    %c3_46 = arith.constant 3 : index
    %c0_47 = arith.constant 0 : index
    %c0_48 = arith.constant 0 : index
    %88 = vector.load %arg7[%c0_45, %c3_46, %c0_47, %c0_48] : memref<1x5x32x1xf32, #tpu.memory_space<vmem>>, vector<1x1x32x1xf32>
    %89 = vector.shape_cast %88 : vector<1x1x32x1xf32> to vector<32x1xf32>
    %90 = vector.broadcast %89 : vector<32x1xf32> to vector<32x56xf32>
    %91 = arith.addf %87, %90 : vector<32x56xf32>
    %cst_49 = arith.constant 0.000000e+00 : f32
    %92 = vector.broadcast %cst_49 : f32 to vector<32x56xf32>
    %93 = arith.maximumf %91, %92 : vector<32x56xf32>
    %94 = vector.broadcast %3 : vector<1x56xf32> to vector<32x56xf32>
    %95 = arith.mulf %93, %94 : vector<32x56xf32>
    %96 = tpu.concatenate %15, %95, %15 in 1 : vector<32x3xf32>, vector<32x56xf32>, vector<32x3xf32> -> vector<32x62xf32>
    %97 = vector.extract_strided_slice %96 {offsets = [0, 0], sizes = [32, 56], strides = [1, 1]} : vector<32x62xf32> to vector<32x56xf32>
    %98 = vector.extract_strided_slice %96 {offsets = [0, 1], sizes = [32, 56], strides = [1, 1]} : vector<32x62xf32> to vector<32x56xf32>
    %99 = vector.extract_strided_slice %96 {offsets = [0, 2], sizes = [32, 56], strides = [1, 1]} : vector<32x62xf32> to vector<32x56xf32>
    %100 = vector.extract_strided_slice %96 {offsets = [0, 3], sizes = [32, 56], strides = [1, 1]} : vector<32x62xf32> to vector<32x56xf32>
    %101 = vector.extract_strided_slice %96 {offsets = [0, 4], sizes = [32, 56], strides = [1, 1]} : vector<32x62xf32> to vector<32x56xf32>
    %102 = vector.extract_strided_slice %96 {offsets = [0, 5], sizes = [32, 56], strides = [1, 1]} : vector<32x62xf32> to vector<32x56xf32>
    %103 = vector.extract_strided_slice %96 {offsets = [0, 6], sizes = [32, 56], strides = [1, 1]} : vector<32x62xf32> to vector<32x56xf32>
    %104 = tpu.concatenate %97, %98, %99, %100, %101, %102, %103 in 0 : vector<32x56xf32>, vector<32x56xf32>, vector<32x56xf32>, vector<32x56xf32>, vector<32x56xf32>, vector<32x56xf32>, vector<32x56xf32> -> vector<224x56xf32>
    %c0_50 = arith.constant 0 : index
    %c4 = arith.constant 4 : index
    %c0_51 = arith.constant 0 : index
    %c0_52 = arith.constant 0 : index
    %105 = vector.load %arg6[%c0_50, %c4, %c0_51, %c0_52] : memref<1x5x32x224xf32, #tpu.memory_space<vmem>>, vector<1x1x32x224xf32>
    %106 = vector.shape_cast %105 : vector<1x1x32x224xf32> to vector<32x224xf32>
    %cst_53 = arith.constant dense<0.000000e+00> : vector<32x56xf32>
    %107 = tpu.matmul %106, %104, %cst_53 {dimension_numbers = #tpu.dot_dimension_numbers<[1], [0], [0], [1], [0, 0, 1, 1], [], []>} : vector<32x224xf32>, vector<224x56xf32>, vector<32x56xf32> -> vector<32x56xf32>
    %c0_54 = arith.constant 0 : index
    %c4_55 = arith.constant 4 : index
    %c0_56 = arith.constant 0 : index
    %c0_57 = arith.constant 0 : index
    %108 = vector.load %arg7[%c0_54, %c4_55, %c0_56, %c0_57] : memref<1x5x32x1xf32, #tpu.memory_space<vmem>>, vector<1x1x32x1xf32>
    %109 = vector.shape_cast %108 : vector<1x1x32x1xf32> to vector<32x1xf32>
    %110 = vector.broadcast %109 : vector<32x1xf32> to vector<32x56xf32>
    %111 = arith.addf %107, %110 : vector<32x56xf32>
    %cst_58 = arith.constant 0.000000e+00 : f32
    %112 = vector.broadcast %cst_58 : f32 to vector<32x56xf32>
    %113 = arith.maximumf %111, %112 : vector<32x56xf32>
    %114 = vector.broadcast %3 : vector<1x56xf32> to vector<32x56xf32>
    %115 = arith.mulf %113, %114 : vector<32x56xf32>
    %c0_59 = arith.constant 0 : index
    %c0_60 = arith.constant 0 : index
    %c0_61 = arith.constant 0 : index
    %116 = vector.load %arg8[%c0_59, %c0_60, %c0_61] : memref<1x8x32xf32, #tpu.memory_space<vmem>>, vector<1x8x32xf32>
    %117 = vector.shape_cast %116 : vector<1x8x32xf32> to vector<8x32xf32>
    %cst_62 = arith.constant dense<0.000000e+00> : vector<8x56xf32>
    %118 = tpu.matmul %117, %115, %cst_62 {dimension_numbers = #tpu.dot_dimension_numbers<[1], [0], [0], [1], [0, 0, 1, 1], [], []>} : vector<8x32xf32>, vector<32x56xf32>, vector<8x56xf32> -> vector<8x56xf32>
    %c0_63 = arith.constant 0 : index
    %c0_64 = arith.constant 0 : index
    %c0_65 = arith.constant 0 : index
    %119 = vector.load %arg9[%c0_63, %c0_64, %c0_65] : memref<1x8x1xf32, #tpu.memory_space<vmem>>, vector<1x8x1xf32>
    %120 = vector.shape_cast %119 : vector<1x8x1xf32> to vector<8x1xf32>
    %121 = vector.broadcast %120 : vector<8x1xf32> to vector<8x56xf32>
    %122 = arith.addf %118, %121 : vector<8x56xf32>
    %c0_66 = arith.constant 0 : index
    %c0_67 = arith.constant 0 : index
    %c0_68 = arith.constant 0 : index
    %123 = vector.load %arg3[%c0_66, %c0_67, %c0_68] : memref<1x56x128xf32, #tpu.memory_space<vmem>>, vector<1x56x128xf32>
    %124 = vector.shape_cast %123 : vector<1x56x128xf32> to vector<56x128xf32>
    %cst_69 = arith.constant dense<0.000000e+00> : vector<8x128xf32>
    %125 = tpu.matmul %122, %124, %cst_69 {dimension_numbers = #tpu.dot_dimension_numbers<[1], [0], [0], [1], [0, 0, 1, 1], [], []>} : vector<8x56xf32>, vector<56x128xf32>, vector<8x128xf32> -> vector<8x128xf32>
    %c0_70 = arith.constant 0 : index
    %c0_71 = arith.constant 0 : index
    %c0_72 = arith.constant 0 : index
    %126 = vector.load %arg10[%c0_70, %c0_71, %c0_72] : memref<1x8x128xf32, #tpu.memory_space<vmem>>, vector<1x8x128xf32>
    %127 = vector.shape_cast %126 : vector<1x8x128xf32> to vector<8x128xf32>
    %128 = vector.shape_cast %125 : vector<8x128xf32> to vector<1x8x128xf32>
    tpu.vector_store %arg10[%c0_70, %c0_71, %c0_72], %128 {strides = array<i32>} : memref<1x8x128xf32, #tpu.memory_space<vmem>>, vector<1x8x128xf32>,
    return
  }
  func.func @transform_0(%arg0: i32) -> (i32, i32, i32) {
    %c0_i32 = arith.constant 0 : i32
    %c0_i32_0 = arith.constant 0 : i32
    %c0_i32_1 = arith.constant 0 : i32
    return %arg0, %c0_i32, %c0_i32_0 : i32, i32, i32
  }
  func.func @transform_1(%arg0: i32) -> (i32, i32, i32) {
    %c0_i32 = arith.constant 0 : i32
    %c0_i32_0 = arith.constant 0 : i32
    %c0_i32_1 = arith.constant 0 : i32
    return %arg0, %c0_i32, %c0_i32_0 : i32, i32, i32
  }
  func.func @transform_2(%arg0: i32) -> (i32, i32, i32) {
    %c0_i32 = arith.constant 0 : i32
    %c0_i32_0 = arith.constant 0 : i32
    %c0_i32_1 = arith.constant 0 : i32
    return %arg0, %c0_i32, %c0_i32_0 : i32, i32, i32
  }
  func.func @transform_3(%arg0: i32) -> (i32, i32, i32) {
    %c0_i32 = arith.constant 0 : i32
    %c0_i32_0 = arith.constant 0 : i32
    %c0_i32_1 = arith.constant 0 : i32
    return %arg0, %c0_i32, %c0_i32_0 : i32, i32, i32
  }
  func.func @transform_4(%arg0: i32) -> (i32, i32, i32) {
    %c0_i32 = arith.constant 0 : i32
    %c0_i32_0 = arith.constant 0 : i32
    %c0_i32_1 = arith.constant 0 : i32
    return %arg0, %c0_i32, %c0_i32_0 : i32, i32, i32
  }
  func.func @transform_5(%arg0: i32) -> (i32, i32, i32, i32) {
    %c0_i32 = arith.constant 0 : i32
    %c0_i32_0 = arith.constant 0 : i32
    %c0_i32_1 = arith.constant 0 : i32
    %c0_i32_2 = arith.constant 0 : i32
    return %arg0, %c0_i32, %c0_i32_0, %c0_i32_1 : i32, i32, i32, i32
  }
  func.func @transform_6(%arg0: i32) -> (i32, i32, i32, i32) {
    %c0_i32 = arith.constant 0 : i32
    %c0_i32_0 = arith.constant 0 : i32
    %c0_i32_1 = arith.constant 0 : i32
    %c0_i32_2 = arith.constant 0 : i32
    return %arg0, %c0_i32, %c0_i32_0, %c0_i32_1 : i32, i32, i32, i32
  }
  func.func @transform_7(%arg0: i32) -> (i32, i32, i32) {
    %c0_i32 = arith.constant 0 : i32
    %c0_i32_0 = arith.constant 0 : i32
    %c0_i32_1 = arith.constant 0 : i32
    return %arg0, %c0_i32, %c0_i32_0 : i32, i32, i32
  }
  func.func @transform_8(%arg0: i32) -> (i32, i32, i32) {
    %c0_i32 = arith.constant 0 : i32
    %c0_i32_0 = arith.constant 0 : i32
    %c0_i32_1 = arith.constant 0 : i32
    return %arg0, %c0_i32, %c0_i32_0 : i32, i32, i32
  }
  func.func @transform_9(%arg0: i32) -> (i32, i32, i32) {
    %c0_i32 = arith.constant 0 : i32
    %c0_i32_0 = arith.constant 0 : i32
    %c0_i32_1 = arith.constant 0 : i32
    return %arg0, %c0_i32, %c0_i32_0 : i32, i32, i32
  }
}

</mosaic_0001>

<bundles_post_ra>
// kernel: tpu_custom_call.1
= control target key start
LH: loop header
LB: loop body
LE: loop exit
PB: predicated region body
PF: predicated region fallthrough
CT: control target
= control target key end

     0   :  { %14 = vsyncpa [#allocation3], 0  ;;  %s3045_s0 = inlined_call_operand.vmem [shape: f32[3,32,56], index: 0, kind: input, shape index: {}]   ;;  %s3046_s1 = inlined_call_operand.vmem [shape: f32[3,1,56], index: 1, kind: input, shape index: {}]   ;;  %s3047_s2 = inlined_call_operand.vmem [shape: f32[3,56,128], index: 2, kind: input, shape index: {}]   ;;  %s3048_s3 = inlined_call_operand.vmem [shape: f32[3,32,32], index: 3, kind: input, shape index: {}]   ;;  %s3049_s4 = inlined_call_operand.vmem [shape: f32[3,32,1], index: 4, kind: input, shape index: {}]   ;;  %s3050_s5 = inlined_call_operand.hbm [shape: f32[3,5,32,224], index: 5, kind: input, shape index: {}]   ;;  %s3051_s6 = inlined_call_operand.vmem [shape: f32[3,5,32,1], index: 6, kind: input, shape index: {}]   ;;  %s3052_s7 = inlined_call_operand.vmem [shape: f32[3,8,32], index: 7, kind: input, shape index: {}]   ;;  %s3053_s8 = inlined_call_operand.vmem [shape: f32[3,8,1], index: 8, kind: input, shape index: {}]   ;;  %s3054_s9 = inlined_call_operand.hbm [shape: f32[3,8,128], index: 9, kind: output, shape index: {}]  }
   0x1   :  { %16 = vsyncpa [#allocation3 + $0x1], 0 }
   0x2   :  { %17 = vsyncpa [#allocation4], 0 }
   0x3   :  { %19 = vsyncpa [#allocation4 + $0x1], 0  ;;  %s2542_s30 = smov 0   ;;  %s2544_s10 = smov 0  }
   0x4   :  { %s2546_s11 = smov 0   ;;  %s2548_s12 = smov 0  }
   0x5 LB: > { %3059 = sst [smem:[#allocation8_spill]] %s2476_s11  ;;  %s2563_s13 = sadd.s32 4294967295, %s2480_s12   ;;  %s2480_s12 = sphi %s2548_s12, %s3068_s12   ;;  %s2476_s11 = sphi %s2546_s11, %s3070_s11   ;;  %s2472_s10 = sphi %s2544_s10, %s3072_s10   ;;  %s2468_s30 = sphi %s2542_s30, %s3071_s30  }
   0x6   : > { %s1889_s14 = sadd.s32 4294967294, %s2480_s12   ;;  %s2567_s15 = sadd.s32 1, %s2480_s12  }
   0x7   : > { %3060 = sst [smem:[#allocation9_spill]] %s2567_s15  ;;  %s162_s16 = sadd.s32 1, %s2476_s11 }
   0x8   : > { %s159_s17 = ssub.s32 %s2480_s12, %s2567_s15  ;;  %p169_p0 = scmp.ne.s32.totalorder %s2476_s11, %s2472_s10 }
   0x9   : > { %p160_p1 = scmp.eq.s32.totalorder %s159_s17, 0  ;;  %p170_p2 = scmp.eq.s32.totalorder %s2480_s12, 0 }
   0xa   : > { %p175_p3 = scmp.ne.s32.totalorder %s2472_s10, %s2468_s30  ;;  %p176_p4 = scmp.eq.s32.totalorder %s2563_s13, 0 }
   0xb   : > { %s2579_s18 = scalar_select %p160_p1, %s2476_s11, %s162_s16  }
   0xc   : > { %p171_p5 = por %p170_p2, %p169_p0  ;;  %p2581_p6 = por %p176_p4, %p175_p3 }
   0xd   : > { %3061 = sst [smem:[#allocation10_spill]] %s2579_s18  ;;  %p277_p7 = scmp.eq.s32.totalorder %s2563_s13, 2 }
   0xe   : > { %p283_p8 = scmp.eq.s32.totalorder %s1889_s14, 2  ;;  %p2035_p9 = scmp.lt.s32.totalorder %s2480_s12, 3 }
   0xf   : > { %p2587_p10 = por %p277_p7, %p169_p0  ;;  %s341_s22 = sand.u32 1, %s2476_s11  }
  0x10   : > { %p2591_p11 = por %p283_p8, %p175_p3  ;;  %s2019_s23 = smul.u32 320, %s2480_s12 }
  0x11   : > { %s2018_s24 = smul.u32 320, %s341_s22  ;;  %p2600_p12 = pnand %p2035_p9, %p171_p5 }
  0x12   : > { %s3064_s21 = scalar_select %p2591_p11, 1, 0 }
  0x13   : > { %s350_s27 = scalar_lea.hbm %s3050_s5, %s2019_s23  ;;  %s345_s14 = scalar_lea.vmem [#allocation2], %s2018_s24 }
  0x14   : > { %3065 = sst [smem:[#allocation11_spill]] %s3064_s21  ;;  %s351_s29 = sshll.u32 %s350_s27, 4  ;;  %s352_s29 = int_to_ptr.hbm [resolvable:$true] %s351_s29 }
  0x15   : > { %s353_s16 = sshll.u32 %s345_s14, 4  ;;  %s342_s17 = scalar_lea.sflag [#allocation3], %s341_s22  ;;  %s354_s16 = int_to_ptr.vmem [resolvable:$true] %s353_s16 }
  0x16   : > { %s2384_s18 = sshra.s32 %s352_s29, 4  ;;  %p2388_p0 = pneg %p2600_p12  ;;  %s2385_s18 = int_to_ptr.hbm [resolvable:$true] %s2384_s18 }
  0x17   : > { %s2386_s11 = scalar_lea.hbm %s2385_s18, 320  ;;  %s2391_s26 = scalar_lea.hbm %s3050_s5, 960 }
  0x18   : > { %p2387_p13 = scmp.ne.s32.totalorder %s2385_s18, %s2386_s11  ;;  %p2392_p3 = scmp.lt.s32.totalorder %s2385_s18, %s3050_s5 }
  0x19   : > { %p2393_p4 = scmp.lt.s32.totalorder %s2391_s26, %s2386_s11 }
  0x1a   : > { %p2389_p1 = pnand %p2388_p0, %p2387_p13 }
  0x1b   : > { %p2394_p5 = por %p2393_p4, %p2392_p3 }
  0x1c   : > { %p2390_p2 = pneg %p2389_p1 }
  0x1e   : > { %p2395_p7 = pnand %p2394_p5, %p2390_p2 }
  0x20   : > { %2398 = shalt.err (!%p2395_p7)
}
  0x21   : > { %s2482_s22 = smov 256   ;;  %s2483_s24 = smov 16  }
  0x22   : > { %2030 = dma.hbm_to_vmem [thread:$0]  (!%p2600_p12), %s352_s29, 5120, %s354_s16, %s342_s17, %s2482_s22, %s2482_s22, %s2483_s24  }
  0x23   : > { %p1893_p8 = scmp.ge.s32.totalorder %s2480_s12, 1  ;;  %p383_p9 = scmp.lt.s32.totalorder %s2480_s12, 4 }
  0x25   : > { %p384_p13 = pnand %p1893_p8, %p383_p9 }
  0x26   : > { %s2617_s27 = sand.u32 (!%p384_p13), 1, %s2472_s10  }
  0x27   : > { %387 = sbr.rel (%p384_p13) target bundleno = 2620 (0xa3c), region = 56  ;;  %s390_s15 = scalar_lea.sflag (!%p384_p13), [#allocation3], %s2617_s27 }
  0x28   : > { %s2020_s11 = smul.u32 (!%p384_p13), 320, %s2617_s27 }
  0x2a   : > { %s2621_s18 = scalar_lea.vmem (!%p384_p13), [#allocation2], %s2020_s11 }
  0x2c   : > { %2459 = dma.done.wait (%p2581_p6), %s390_s15, 5120  }
  0x2d   : > { %2461 = vsyncadd (%p2581_p6), %s390_s15, 4294962176  ;;  %p465_p12 = scmp.lt.s32.totalorder %s2563_s13, 2  ;;  %v2484_v0 = vmov 0   ;;  %vm534_vm0 = vcmask 261120   ;;  %vm603_vm1 = vcmask 23552   ;;  %vm608_vm2 = vcmask 482304  }
  0x2e   : > { %2080 = vset.pattern.permute.xlu1 %v2484_v0  ;;  %2079 = vset.pattern.permute.xlu0 %v2484_v0  ;;  %s2486_s29 = smov 125   ;;  %s2487_s14 = smov 122   ;;  %vm721_vm3 = vcmask 785408   ;;  %vm1685_vm4 = vcmask 457728  }
  0x2f   : > { %s2629_s21 = scalar_select %p465_p12, %s2563_s13, 2  ;;  %2141 = vset.pattern.permute.xlu2 %v2484_v0 }
  0x30   : > { %s2489_s17 = smov 123   ;;  %s2490_s23 = smov 127  }
  0x31   : > { %s2003_s28 = sshll.u32 %s2629_s21, 5  ;;  %s2639_s19 = scalar_lea.vmem %s3046_s1, %s2629_s21 }
  0x32   : > { %s469_s16 = scalar_lea.vmem %s3045_s0, %s2003_s28  ;;  %s487_s22 = scalar_lea.vmem %s3049_s4, %s2003_s28  ;;  %v2652_v16 = vld [vmem:[%s2639_s19] ss:$0 sm:$0xff] }
  0x33   : > { %v504_v1 = vld [vmem:[%s469_s16 + $0x18] sm:$0xff]  ;;  %v503_v2 = vld [vmem:[%s469_s16 + $0x10] sm:$0xff]  ;;  %v502_v3 = vld [vmem:[%s469_s16 + $0x8] sm:$0xff]  ;;  %s482_s15 = scalar_lea.vmem %s3048_s3, %s2003_s28  ;;  %s2485_s28 = smov 3  }
  0x34   : > { %559 = vmatpush.msra.mxu0 %v504_v1  ;;  %v511_v4 = vld [vmem:[%s487_s22 + $0x8] sm:$0xff]  ;;  %v513_v5 = vld [vmem:[%s487_s22 + $0x18] sm:$0xff]  ;;  %v501_v6 = vld [vmem:[%s469_s16] sm:$0xff]  ;;  %s2488_s16 = smov 126   ;;  %s2022_s25 = smul.u32 160, %s2629_s21 }
  0x35   : > { %521 = vperm.xlu1 %2080, %v511_v4   ;;  %531 = vperm.xlu0 %2079, %v513_v5   ;;  %v506_v7 = vld [vmem:[%s482_s15] sm:$0xff]  ;;  %v512_v9 = vld [vmem:[%s487_s22 + $0x10] sm:$0xff]  ;;  %v507_v10 = vld [vmem:[%s482_s15 + $0x8] sm:$0xff]  ;;  %s2491_s26 = smov 124  }
  0x36   : > { %560 = vmatpush.msra.mxu0 %v503_v2  ;;  %v510_v8 = vld [vmem:[%s487_s22] sm:$0xff]  ;;  %v508_v11 = vld [vmem:[%s482_s15 + $0x10] sm:$0xff]  ;;  %v509_v12 = vld [vmem:[%s482_s15 + $0x18] sm:$0xff]  ;;  %s2698_s11 = scalar_lea.vmem %s3051_s6, %s2022_s25  ;;  %s2000_s22 = sshll.u32 %s2563_s13, 3 }
  0x37   : > { %v698_v48 = vld [vmem:[%s2698_s11 + $0x8] sm:$0xff]  ;;  %v699_v49 = vld [vmem:[%s2698_s11 + $0x10] sm:$0xff] }
  0x38   : > { %561 = vmatpush.msra.mxu0 %v502_v3 }
  0x3a   : > { %562 = vmatpush.msra.mxu0 %v501_v6 }
  0x3b   : > { %1905 = vmatmul.msk.f32.vlgmr.msra.gmra.mxu0 %vm534_vm0, %v506_v7 }
  0x3d   : > { %516 = vperm.xlu1 %2080, %v510_v8   ;;  %526 = vperm.xlu0 %2079, %v512_v9  }
  0x43   : > { %1906 = vmatmul.msk.f32.gmra.mxu0 %vm534_vm0, %v507_v10 }
  0x4b   : > { %1907 = vmatmul.msk.f32.gmra.mxu0 %vm534_vm0, %v508_v11 }
  0x53   : > { %1908 = vmatmul.msk.f32.gmra.mxu0 %vm534_vm0, %v509_v12 }
  0xa7   : > { %v522_v13 = vpop.permute.xlu1 %521  ;;  %v532_v24 = vpop.permute.xlu0 %531 }
  0xaf   : > { %v517_v14 = vpop.permute.xlu1 %516  ;;  %v527_v28 = vpop.permute.xlu0 %526 }
  0xb8   : > { %v564_v15 = vpop.f32.mrf.mxu0 }
  0xb9   : > { %v565_v17 = vadd.f32 %v564_v15, %v517_v14 }
  0xbb   : > { %v576_v18 = vmax.f32 %v565_v17, 0.0 }
  0xbd   : > { %v583_v19 = vmul.f32 %v2652_v16, %v576_v18 }
  0xbf   : > { %591 = vrot.lane.b32.xlu1 %v583_v19, %s2485_s28 }
  0xc0   : > { %v567_v20 = vpop.f32.mrf.mxu0 }
  0xc1   : > { %v568_v21 = vadd.f32 %v567_v20, %v522_v13  ;;  %v700_v20 = vld [vmem:[%s2698_s11 + $0x18] sm:$0xff] }
  0xc3   : > { %v577_v22 = vmax.f32 %v568_v21, 0.0 }
  0xc5   : > { %v584_v23 = vmul.f32 %v2652_v16, %v577_v22 }
  0xc7   : > { %593 = vrot.lane.b32.xlu0 %v584_v23, %s2485_s28 }
  0xc8   : > { %v570_v25 = vpop.f32.mrf.mxu0 }
  0xc9   : > { %v571_v30 = vadd.f32 %v570_v25, %v527_v28  ;;  %v690_v25 = vld [vmem:[%s2621_s18 + $0x8] sm:$0xff]  ;;  %v692_v28 = vld [vmem:[%s2621_s18 + $0x18] sm:$0xff] }
  0xcb   : > { %v578_v32 = vmax.f32 %v571_v30, 0.0  ;;  %v694_v30 = vld [vmem:[%s2621_s18 + $0x28] sm:$0xff] }
  0xcd   : > { %v585_v33 = vmul.f32 %v2652_v16, %v578_v32  ;;  %v695_v32 = vld [vmem:[%s2621_s18 + $0x30] sm:$0xff] }
  0xd0   : > { %v573_v26 = vpop.f32.mrf.mxu0 }
  0xd1   : > { %v574_v27 = vadd.f32 %v573_v26, %v532_v24  ;;  %v689_v24 = vld [vmem:[%s2621_s18] sm:$0xff] }
  0xd2   : > { %v697_v26 = vld [vmem:[%s2698_s11] sm:$0xff] }
  0xd3   : > { %v579_v29 = vmax.f32 %v574_v27, 0.0  ;;  %v691_v27 = vld [vmem:[%s2621_s18 + $0x10] sm:$0xff] }
  0xd5   : > { %v586_v31 = vmul.f32 %v2652_v16, %v579_v29  ;;  %v693_v29 = vld [vmem:[%s2621_s18 + $0x20] sm:$0xff] }
  0xd7   : > { %597 = vrot.lane.b32.xlu2 %v586_v31, %s2485_s28  ;;  %v696_v31 = vld [vmem:[%s2621_s18 + $0x38] sm:$0xff] }
  0xdf   : > { %595 = vrot.lane.b32.xlu2 %v585_v33, %s2485_s28 }
 0x131   : > { %v598_v34 = vpop.permute.xlu2 %597  ;;  %v592_v35 = vpop.permute.xlu1 %591 }
 0x132   : > { %v2663_v36 = vsel %vm603_vm1, 0.0, %v598_v34  ;;  %v2666_v37 = vsel %vm603_vm1, 0.0, %v592_v35 }
 0x133   : > { %v612_v42 = vsel %vm608_vm2, %v2663_v36, 0.0  ;;  %v609_v43 = vsel %vm608_vm2, %v2666_v37, 0.0 }
 0x139   : > { %v596_v38 = vpop.permute.xlu2 %595  ;;  %v594_v39 = vpop.permute.xlu0 %593 }
 0x13a   : > { %v2669_v40 = vsel %vm603_vm1, 0.0, %v596_v38  ;;  %v2672_v41 = vsel %vm603_vm1, 0.0, %v594_v39 }
 0x13b   : > { %v611_v44 = vsel %vm608_vm2, %v2669_v40, 0.0  ;;  %v610_v45 = vsel %vm608_vm2, %v2672_v41, 0.0 }
 0x13c   : > { %v2091_v46 = vpack.i.bf16 %v611_v44, %v612_v42  ;;  %v2081_v47 = vpack.i.bf16 %v609_v43, %v610_v45 }
 0x13e   : > { %2092 = vrot.lane.b32.xlu2 %v2091_v46, %s2486_s29  ;;  %2097 = vrot.lane.b32.xlu1 %v2091_v46, %s2487_s14 }
 0x13f   : > { %2082 = vrot.lane.b32.xlu0 %v2081_v47, %s2486_s29 }
 0x146   : > { %2112 = vrot.lane.b32.xlu2 %v2091_v46, %s2488_s16  ;;  %2102 = vrot.lane.b32.xlu1 %v2081_v47, %s2488_s16 }
 0x147   : > { %2087 = vrot.lane.b32.xlu0 %v2081_v47, %s2487_s14 }
 0x14e   : > { %2117 = vrot.lane.b32.xlu2 %v2091_v46, %s2489_s17  ;;  %2107 = vrot.lane.b32.xlu1 %v2081_v47, %s2489_s17 }
 0x14f   : > { %2127 = vrot.lane.b32.xlu0 %v2091_v46, %s2490_s23 }
 0x156   : > { %2122 = vrot.lane.b32.xlu2 %v2081_v47, %s2490_s23  ;;  %2137 = vrot.lane.b32.xlu1 %v2081_v47, %s2491_s26 }
 0x157   : > { %2132 = vrot.lane.b32.xlu0 %v2091_v46, %s2491_s26 }
 0x15e   : > { %708 = vperm.xlu1 %2080, %v698_v48   ;;  %718 = vperm.xlu2 %2141, %v700_v20  }
 0x15f   : > { %713 = vperm.xlu0 %2079, %v699_v49  }
 0x166   : > { %703 = vperm.xlu2 %2141, %v697_v26  }
 0x198   : > { %v2093_v50 = vpop.permute.xlu2 %2092 }
 0x199   : > { %v2094_v51 = vunpack.i.l.bf16 %v2093_v50  ;;  %v2095_v52 = vunpack.i.h.bf16 %v2093_v50 }
 0x19b   : > { %734 = vmatpush.msra.mxu1 %v2094_v51 }
 0x19d   : > { %735 = vmatpush.msra.mxu1 %v2095_v52 }
 0x1a0   : > { %v2113_v53 = vpop.permute.xlu2 %2112 }
 0x1a1   : > { %v2114_v60 = vunpack.i.l.bf16 %v2113_v53  ;;  %v2115_v62 = vunpack.i.h.bf16 %v2113_v53 }
 0x1a8   : > { %v2118_v63 = vpop.permute.xlu2 %2117 }
 0x1a9   : > { %v2119_v5 = vunpack.i.l.bf16 %v2118_v63  ;;  %v2120_v7 = vunpack.i.h.bf16 %v2118_v63 }
 0x1b0   : > { %v2098_v54 = vpop.permute.xlu1 %2097  ;;  %v2123_v11 = vpop.permute.xlu2 %2122 }
 0x1b1   : > { %v2083_v55 = vpop.permute.xlu0 %2082  ;;  %v2099_v56 = vunpack.i.l.bf16 %v2098_v54  ;;  %v2100_v58 = vunpack.i.h.bf16 %v2098_v54  ;;  %v2124_v14 = vunpack.i.l.bf16 %v2123_v11  ;;  %v2125_v15 = vunpack.i.h.bf16 %v2123_v11  ;;  %v1926_v11 = vld [vmem:[%s2698_s11 + $0x28] sm:$0xff] }
 0x1b2   : > { %v2084_v57 = vunpack.i.l.bf16 %v2083_v55  ;;  %v2085_v59 = vunpack.i.h.bf16 %v2083_v55 }
 0x1b3   : > { %767 = vmatpush.msra.mxu2 %v2099_v56 }
 0x1b4   : > { %736 = vmatpush.msra.mxu1 %v2084_v57 }
 0x1b5   : > { %768 = vmatpush.msra.mxu2 %v2100_v58 }
 0x1b6   : > { %737 = vmatpush.msra.mxu1 %v2085_v59 }
 0x1b8   : > { %738 = vmatpush.msra.mxu1 %v2114_v60  ;;  %v2103_v61 = vpop.permute.xlu1 %2102  ;;  %v719_v42 = vpop.permute.xlu2 %718 }
 0x1b9   : > { %v2088_v0 = vpop.permute.xlu0 %2087  ;;  %v2104_v1 = vunpack.i.l.bf16 %v2103_v61  ;;  %v2105_v3 = vunpack.i.h.bf16 %v2103_v61 }
 0x1ba   : > { %739 = vmatpush.msra.mxu1 %v2115_v62  ;;  %v2089_v2 = vunpack.i.l.bf16 %v2088_v0  ;;  %v2090_v4 = vunpack.i.h.bf16 %v2088_v0 }
 0x1bc   : > { %740 = vmatpush.msra.mxu1 %v2104_v1  ;;  %769 = vmatpush.msra.mxu2 %v2089_v2 }
 0x1be   : > { %741 = vmatpush.msra.mxu1 %v2105_v3  ;;  %770 = vmatpush.msra.mxu2 %v2090_v4 }
 0x1c0   : > { %771 = vmatpush.msra.mxu2 %v2119_v5  ;;  %v2108_v6 = vpop.permute.xlu1 %2107  ;;  %v704_v52 = vpop.permute.xlu2 %703 }
 0x1c1   : > { %v2128_v8 = vpop.permute.xlu0 %2127  ;;  %v2109_v9 = vunpack.i.l.bf16 %v2108_v6  ;;  %v2110_v13 = vunpack.i.h.bf16 %v2108_v6 }
 0x1c2   : > { %772 = vmatpush.msra.mxu2 %v2120_v7  ;;  %v2129_v10 = vunpack.i.l.bf16 %v2128_v8  ;;  %v2130_v12 = vunpack.i.h.bf16 %v2128_v8 }
 0x1c4   : > { %742 = vmatpush.msra.mxu1 %v2129_v10  ;;  %773 = vmatpush.msra.mxu2 %v2109_v9 }
 0x1c6   : > { %743 = vmatpush.msra.mxu1 %v2130_v12  ;;  %774 = vmatpush.msra.mxu2 %v2110_v13  ;;  %v1928_v12 = vld [vmem:[%s2698_s11 + $0x38] sm:$0xff]  ;;  %v1925_v13 = vld [vmem:[%s2698_s11 + $0x20] sm:$0xff] }
 0x1c8   : > { %744 = vmatpush.msra.mxu1 %v2124_v14  ;;  %v2138_v19 = vpop.permute.xlu1 %2137  ;;  %v1927_v14 = vld [vmem:[%s2698_s11 + $0x30] sm:$0xff] }
 0x1c9   : > { %v2133_v17 = vpop.permute.xlu0 %2132  ;;  %v2139_v22 = vunpack.i.l.bf16 %v2138_v19  ;;  %v2140_v23 = vunpack.i.h.bf16 %v2138_v19 }
 0x1ca   : > { %745 = vmatpush.msra.mxu1 %v2125_v15  ;;  %v2134_v18 = vunpack.i.l.bf16 %v2133_v17  ;;  %v2135_v21 = vunpack.i.h.bf16 %v2133_v17 }
 0x1cc   : > { %1909 = vmatpush.msk.msra.mxu1 %vm608_vm2, %v2663_v36  ;;  %775 = vmatpush.msra.mxu2 %v2134_v18 }
 0x1ce   : > { %1910 = vmatpush.msk.msra.mxu1 %vm608_vm2, %v2669_v40  ;;  %776 = vmatpush.msra.mxu2 %v2135_v21 }
 0x1d0   : > { %1911 = vmatpush.msk.msra.mxu1 %vm608_vm2, %v2672_v41  ;;  %777 = vmatpush.msra.mxu2 %v2139_v22  ;;  %v709_v36 = vpop.permute.xlu1 %708 }
 0x1d1   : > { %v714_v44 = vpop.permute.xlu0 %713 }
 0x1d2   : > { %1912 = vmatpush.msk.msra.mxu1 %vm608_vm2, %v2666_v37  ;;  %778 = vmatpush.msra.mxu2 %v2140_v23 }
 0x1d3   : > { %750 = vmatmul.f32.vlgmr.msra.gmra.mxu1 %v689_v24  ;;  %1913 = vmatmul.msk.f32.vlgmr.msra.gmra.mxu2 %vm721_vm3, %v690_v25 }
 0x1db   : > { %753 = vmatmul.f32.gmra.mxu1 %v691_v27  ;;  %1914 = vmatmul.msk.f32.gmra.mxu2 %vm721_vm3, %v692_v28 }
 0x1e3   : > { %756 = vmatmul.f32.gmra.mxu1 %v693_v29  ;;  %1915 = vmatmul.msk.f32.gmra.mxu2 %vm721_vm3, %v694_v30 }
 0x1eb   : > { %1916 = vmatmul.msk.f32.gmra.mxu2 %vm721_vm3, %v696_v31  ;;  %759 = vmatmul.f32.gmra.mxu1 %v695_v32 }
 0x250   : > { %v751_v33 = vpop.f32.mrf.mxu1 }
 0x251   : > { %v752_v54 = vadd.f32 %v751_v33, %v704_v52 }
 0x256   : > { %v780_v34 = vpop.f32.mrf.mxu2 }
 0x257   : > { %v781_v57 = vadd.f32 %v780_v34, %v752_v54  ;;  %v1919_v54 = vld [vmem:[%s2621_s18 + $0x50] sm:$0xff] }
 0x258   : > { %v754_v35 = vpop.f32.mrf.mxu1 }
 0x259   : > { %v755_v37 = vadd.f32 %v754_v35, %v709_v36  ;;  %v792_v59 = vmax.f32 %v781_v57, 0.0  ;;  %v1922_v57 = vld [vmem:[%s2621_s18 + $0x68] sm:$0xff] }
 0x25b   : > { %v796_v60 = vmul.f32 %v2652_v16, %v792_v59  ;;  %v1924_v59 = vld [vmem:[%s2621_s18 + $0x78] sm:$0xff] }
 0x25e   : > { %v783_v38 = vpop.f32.mrf.mxu2 }
 0x25f   : > { %v784_v39 = vadd.f32 %v783_v38, %v755_v37 }
 0x260   : > { %v757_v40 = vpop.f32.mrf.mxu1 }
 0x261   : > { %v793_v41 = vmax.f32 %v784_v39, 0.0  ;;  %v758_v45 = vadd.f32 %v757_v40, %v714_v44 }
 0x263   : > { %v797_v43 = vmul.f32 %v2652_v16, %v793_v41 }
 0x265   : > { %806 = vrot.lane.b32.xlu2 %v797_v43, %s2485_s28 }
 0x266   : > { %v786_v46 = vpop.f32.mrf.mxu2 }
 0x267   : > { %v787_v47 = vadd.f32 %v786_v46, %v758_v45 }
 0x268   : > { %v760_v48 = vpop.f32.mrf.mxu1 }
 0x269   : > { %v794_v49 = vmax.f32 %v787_v47, 0.0  ;;  %v761_v51 = vadd.f32 %v760_v48, %v719_v42 }
 0x26b   : > { %v798_v50 = vmul.f32 %v2652_v16, %v794_v49 }
 0x26d   : > { %808 = vrot.lane.b32.xlu1 %v798_v50, %s2485_s28  ;;  %v1917_v50 = vld [vmem:[%s2621_s18 + $0x40] sm:$0xff] }
 0x26e   : > { %v789_v53 = vpop.f32.mrf.mxu2 }
 0x26f   : > { %v790_v55 = vadd.f32 %v789_v53, %v761_v51  ;;  %v1918_v53 = vld [vmem:[%s2621_s18 + $0x48] sm:$0xff] }
 0x271   : > { %v795_v56 = vmax.f32 %v790_v55, 0.0  ;;  %v1920_v55 = vld [vmem:[%s2621_s18 + $0x58] sm:$0xff] }
 0x273   : > { %v799_v58 = vmul.f32 %v2652_v16, %v795_v56  ;;  %v1921_v56 = vld [vmem:[%s2621_s18 + $0x60] sm:$0xff] }
 0x275   : > { %810 = vrot.lane.b32.xlu0 %v799_v58, %s2485_s28  ;;  %v1923_v58 = vld [vmem:[%s2621_s18 + $0x70] sm:$0xff] }
 0x27d   : > { %804 = vrot.lane.b32.xlu0 %v796_v60, %s2485_s28 }
 0x2bf   : > { %v807_v4 = vpop.permute.xlu2 %806 }
 0x2c0   : > { %v2745_v5 = vsel %vm603_vm1, 0.0, %v807_v4 }
 0x2c1   : > { %v821_v8 = vsel %vm608_vm2, %v2745_v5, 0.0 }
 0x2df   : > { %v809_v61 = vpop.permute.xlu1 %808 }
 0x2e0   : > { %v2733_v62 = vsel %vm603_vm1, 0.0, %v809_v61 }
 0x2e1   : > { %v822_v1 = vsel %vm608_vm2, %v2733_v62, 0.0 }
 0x2e7   : > { %v811_v63 = vpop.permute.xlu0 %810 }
 0x2e8   : > { %v2736_v0 = vsel %vm603_vm1, 0.0, %v811_v63 }
 0x2e9   : > { %v823_v2 = vsel %vm608_vm2, %v2736_v0, 0.0 }
 0x2ea   : > { %v2142_v3 = vpack.i.bf16 %v822_v1, %v823_v2 }
 0x2ec   : > { %2143 = vrot.lane.b32.xlu1 %v2142_v3, %s2486_s29  ;;  %2163 = vrot.lane.b32.xlu0 %v2142_v3, %s2488_s16 }
 0x2ef   : > { %v805_v6 = vpop.permute.xlu0 %804 }
 0x2f0   : > { %v2748_v7 = vsel %vm603_vm1, 0.0, %v805_v6 }
 0x2f1   : > { %v820_v9 = vsel %vm608_vm2, %v2748_v7, 0.0 }
 0x2f2   : > { %v2152_v10 = vpack.i.bf16 %v820_v9, %v821_v8 }
 0x2f4   : > { %2178 = vrot.lane.b32.xlu0 %v2142_v3, %s2487_s14  ;;  %2153 = vrot.lane.b32.xlu1 %v2152_v10, %s2488_s16 }
 0x2f5   : > { %2148 = vrot.lane.b32.xlu2 %v2152_v10, %s2486_s29 }
 0x2fc   : > { %2183 = vrot.lane.b32.xlu0 %v2142_v3, %s2489_s17  ;;  %2158 = vrot.lane.b32.xlu1 %v2152_v10, %s2490_s23 }
 0x2fd   : > { %2168 = vrot.lane.b32.xlu2 %v2142_v3, %s2490_s23 }
 0x304   : > { %2198 = vrot.lane.b32.xlu0 %v2152_v10, %s2491_s26  ;;  %2188 = vrot.lane.b32.xlu1 %v2152_v10, %s2489_s17 }
 0x305   : > { %2173 = vrot.lane.b32.xlu2 %v2152_v10, %s2487_s14 }
 0x30c   : > { %921 = vperm.xlu0 %2079, %v1926_v11   ;;  %931 = vperm.xlu1 %2080, %v1928_v12  }
 0x30d   : > { %2193 = vrot.lane.b32.xlu2 %v2142_v3, %s2491_s26 }
 0x314   : > { %916 = vperm.xlu1 %2080, %v1925_v13  }
 0x315   : > { %926 = vperm.xlu2 %2141, %v1927_v14  }
 0x34f   : > { %v2149_v15 = vpop.permute.xlu2 %2148 }
 0x350   : > { %v2150_v22 = vunpack.i.l.bf16 %v2149_v15  ;;  %v2151_v23 = vunpack.i.h.bf16 %v2149_v15 }
 0x357   : > { %v2169_v17 = vpop.permute.xlu2 %2168 }
 0x358   : > { %v2170_v37 = vunpack.i.l.bf16 %v2169_v17  ;;  %v2171_v39 = vunpack.i.h.bf16 %v2169_v17 }
 0x35e   : > { %v2144_v18 = vpop.permute.xlu1 %2143  ;;  %v2164_v19 = vpop.permute.xlu0 %2163 }
 0x35f   : > { %v2145_v20 = vunpack.i.l.bf16 %v2144_v18  ;;  %v2146_v21 = vunpack.i.h.bf16 %v2144_v18  ;;  %v2165_v26 = vunpack.i.l.bf16 %v2164_v19  ;;  %v2174_v28 = vpop.permute.xlu2 %2173  ;;  %v2166_v29 = vunpack.i.h.bf16 %v2164_v19 }
 0x360   : > { %v2175_v32 = vunpack.i.l.bf16 %v2174_v28  ;;  %v2176_v34 = vunpack.i.h.bf16 %v2174_v28 }
 0x361   : > { %946 = vmatpush.msra.mxu3 %v2145_v20 }
 0x363   : > { %947 = vmatpush.msra.mxu3 %v2146_v21 }
 0x365   : > { %948 = vmatpush.msra.mxu3 %v2150_v22 }
 0x366   : > { %v2154_v24 = vpop.permute.xlu1 %2153  ;;  %v2179_v25 = vpop.permute.xlu0 %2178 }
 0x367   : > { %949 = vmatpush.msra.mxu3 %v2151_v23  ;;  %v2180_v27 = vunpack.i.l.bf16 %v2179_v25  ;;  %v2181_v30 = vunpack.i.h.bf16 %v2179_v25  ;;  %v2155_v31 = vunpack.i.l.bf16 %v2154_v24  ;;  %v2156_v33 = vunpack.i.h.bf16 %v2154_v24  ;;  %v2194_v45 = vpop.permute.xlu2 %2193 }
 0x368   : > { %v2195_v47 = vunpack.i.l.bf16 %v2194_v45  ;;  %v2196_v49 = vunpack.i.h.bf16 %v2194_v45 }
 0x369   : > { %950 = vmatpush.msra.mxu3 %v2165_v26  ;;  %979 = vmatpush.msrb.mxu0 %v2180_v27 }
 0x36b   : > { %951 = vmatpush.msra.mxu3 %v2166_v29  ;;  %980 = vmatpush.msrb.mxu0 %v2181_v30 }
 0x36d   : > { %952 = vmatpush.msra.mxu3 %v2155_v31  ;;  %981 = vmatpush.msrb.mxu0 %v2175_v32 }
 0x36e   : > { %v2159_v35 = vpop.permute.xlu1 %2158  ;;  %v2184_v36 = vpop.permute.xlu0 %2183 }
 0x36f   : > { %953 = vmatpush.msra.mxu3 %v2156_v33  ;;  %982 = vmatpush.msrb.mxu0 %v2176_v34  ;;  %v2185_v38 = vunpack.i.l.bf16 %v2184_v36  ;;  %v2186_v40 = vunpack.i.h.bf16 %v2184_v36  ;;  %v2160_v41 = vunpack.i.l.bf16 %v2159_v35  ;;  %v2161_v42 = vunpack.i.h.bf16 %v2159_v35 }
 0x371   : > { %954 = vmatpush.msra.mxu3 %v2170_v37  ;;  %983 = vmatpush.msrb.mxu0 %v2185_v38 }
 0x373   : > { %955 = vmatpush.msra.mxu3 %v2171_v39  ;;  %984 = vmatpush.msrb.mxu0 %v2186_v40  ;;  %v1947_v39 = vld [vmem:[%s2698_s11 + $0x50] sm:$0xff]  ;;  %v1946_v40 = vld [vmem:[%s2698_s11 + $0x48] sm:$0xff] }
 0x375   : > { %956 = vmatpush.msra.mxu3 %v2160_v41  ;;  %v1948_v41 = vld [vmem:[%s2698_s11 + $0x58] sm:$0xff] }
 0x376   : > { %v2189_v43 = vpop.permute.xlu1 %2188  ;;  %v2199_v48 = vpop.permute.xlu0 %2198 }
 0x377   : > { %957 = vmatpush.msra.mxu3 %v2161_v42  ;;  %v2190_v44 = vunpack.i.l.bf16 %v2189_v43  ;;  %v2191_v46 = vunpack.i.h.bf16 %v2189_v43  ;;  %v2200_v51 = vunpack.i.l.bf16 %v2199_v48  ;;  %v2201_v52 = vunpack.i.h.bf16 %v2199_v48  ;;  %v1945_v42 = vld [vmem:[%s2698_s11 + $0x40] sm:$0xff] }
 0x379   : > { %1929 = vmatpush.msk.msra.mxu3 %vm608_vm2, %v2736_v0  ;;  %985 = vmatpush.msrb.mxu0 %v2190_v44 }
 0x37b   : > { %1930 = vmatpush.msk.msra.mxu3 %vm608_vm2, %v2733_v62  ;;  %986 = vmatpush.msrb.mxu0 %v2191_v46 }
 0x37d   : > { %1931 = vmatpush.msk.msra.mxu3 %vm608_vm2, %v2745_v5  ;;  %987 = vmatpush.msrb.mxu0 %v2195_v47  ;;  %v927_v5 = vpop.permute.xlu2 %926 }
 0x37e   : > { %v922_v63 = vpop.permute.xlu0 %921 }
 0x37f   : > { %1932 = vmatpush.msk.msra.mxu3 %vm608_vm2, %v2748_v7  ;;  %988 = vmatpush.msrb.mxu0 %v2196_v49  ;;  %v932_v7 = vpop.permute.xlu1 %931 }
 0x380   : > { %962 = vmatmul.f32.vlgmr.msra.gmra.mxu3 %v1917_v50 }
 0x381   : > { %989 = vmatpush.msrb.mxu0 %v2200_v51 }
 0x383   : > { %990 = vmatpush.msrb.mxu0 %v2201_v52 }
 0x384   : > { %1933 = vmatmul.msk.f32.vlgmr.msrb.gmra.mxu0 %vm721_vm3, %v1918_v53 }
 0x387   : > { %v917_v17 = vpop.permute.xlu1 %916 }
 0x388   : > { %965 = vmatmul.f32.gmra.mxu3 %v1919_v54 }
 0x38c   : > { %1934 = vmatmul.msk.f32.gmra.mxu0 %vm721_vm3, %v1920_v55 }
 0x390   : > { %968 = vmatmul.f32.gmra.mxu3 %v1921_v56 }
 0x394   : > { %1935 = vmatmul.msk.f32.gmra.mxu0 %vm721_vm3, %v1922_v57 }
 0x398   : > { %971 = vmatmul.f32.gmra.mxu3 %v1923_v58 }
 0x39c   : > { %1936 = vmatmul.msk.f32.gmra.mxu0 %vm721_vm3, %v1924_v59 }
 0x401   : > { %v992_v60 = vpop.f32.mrf.mxu0 }
 0x403   : > { %v963_v61 = vpop.f32.mrf.mxu3 }
 0x404   : > { %v964_v18 = vadd.f32 %v963_v61, %v917_v17  ;;  %v1938_v17 = vld [vmem:[%s2621_s18 + $0x88] sm:$0xff] }
 0x406   : > { %v993_v21 = vadd.f32 %v992_v60, %v964_v18  ;;  %v1939_v18 = vld [vmem:[%s2621_s18 + $0x90] sm:$0xff] }
 0x408   : > { %v1004_v23 = vmax.f32 %v993_v21, 0.0  ;;  %v1942_v21 = vld [vmem:[%s2621_s18 + $0xa8] sm:$0xff] }
 0x409   : > { %v995_v62 = vpop.f32.mrf.mxu0 }
 0x40a   : > { %v1008_v24 = vmul.f32 %v2652_v16, %v1004_v23  ;;  %v1944_v23 = vld [vmem:[%s2621_s18 + $0xb8] sm:$0xff] }
 0x40b   : > { %v966_v0 = vpop.f32.mrf.mxu3 }
 0x40c   : > { %v967_v1 = vadd.f32 %v966_v0, %v922_v63 }
 0x40e   : > { %v996_v2 = vadd.f32 %v995_v62, %v967_v1 }
 0x410   : > { %v1005_v3 = vmax.f32 %v996_v2, 0.0 }
 0x411   : > { %v998_v4 = vpop.f32.mrf.mxu0 }
 0x412   : > { %v1009_v6 = vmul.f32 %v2652_v16, %v1005_v3 }
 0x413   : > { %v969_v8 = vpop.f32.mrf.mxu3 }
 0x414   : > { %v970_v9 = vadd.f32 %v969_v8, %v927_v5  ;;  %1018 = vrot.lane.b32.xlu1 %v1009_v6, %s2485_s28 }
 0x416   : > { %v999_v10 = vadd.f32 %v998_v4, %v970_v9 }
 0x418   : > { %v1006_v11 = vmax.f32 %v999_v10, 0.0 }
 0x419   : > { %v1001_v14 = vpop.f32.mrf.mxu0 }
 0x41a   : > { %v1010_v12 = vmul.f32 %v2652_v16, %v1006_v11 }
 0x41b   : > { %v972_v13 = vpop.f32.mrf.mxu3 }
 0x41c   : > { %v973_v15 = vadd.f32 %v972_v13, %v932_v7  ;;  %1020 = vrot.lane.b32.xlu0 %v1010_v12, %s2485_s28  ;;  %v1937_v13 = vld [vmem:[%s2621_s18 + $0x80] sm:$0xff] }
 0x41e   : > { %v1002_v19 = vadd.f32 %v1001_v14, %v973_v15 }
 0x420   : > { %v1007_v20 = vmax.f32 %v1002_v19, 0.0  ;;  %v1940_v19 = vld [vmem:[%s2621_s18 + $0x98] sm:$0xff] }
 0x422   : > { %v1011_v22 = vmul.f32 %v2652_v16, %v1007_v20  ;;  %v1941_v20 = vld [vmem:[%s2621_s18 + $0xa0] sm:$0xff] }
 0x424   : > { %1022 = vrot.lane.b32.xlu2 %v1011_v22, %s2485_s28  ;;  %v1943_v22 = vld [vmem:[%s2621_s18 + $0xb0] sm:$0xff] }
 0x42c   : > { %1016 = vrot.lane.b32.xlu2 %v1008_v24, %s2485_s28 }
 0x47e   : > { %v1023_v25 = vpop.permute.xlu2 %1022 }
 0x47f   : > { %v2808_v33 = vsel %vm603_vm1, 0.0, %v1023_v25 }
 0x480   : > { %v1035_v36 = vsel %vm608_vm2, %v2808_v33, 0.0 }
 0x486   : > { %v1019_v26 = vpop.permute.xlu1 %1018  ;;  %v1017_v27 = vpop.permute.xlu2 %1016 }
 0x487   : > { %v2797_v28 = vsel %vm603_vm1, 0.0, %v1019_v26  ;;  %v2800_v29 = vsel %vm603_vm1, 0.0, %v1017_v27 }
 0x488   : > { %v1033_v30 = vsel %vm608_vm2, %v2797_v28, 0.0  ;;  %v1032_v31 = vsel %vm608_vm2, %v2800_v29, 0.0 }
 0x489   : > { %v2207_v32 = vpack.i.bf16 %v1032_v31, %v1033_v30 }
 0x48b   : > { %2208 = vrot.lane.b32.xlu1 %v2207_v32, %s2486_s29 }
 0x48e   : > { %v1021_v34 = vpop.permute.xlu0 %1020 }
 0x48f   : > { %v2811_v35 = vsel %vm603_vm1, 0.0, %v1021_v34 }
 0x490   : > { %v1034_v37 = vsel %vm608_vm2, %v2811_v35, 0.0 }
 0x491   : > { %v2202_v38 = vpack.i.bf16 %v1034_v37, %v1035_v36 }
 0x493   : > { %2203 = vrot.lane.b32.xlu0 %v2202_v38, %s2486_s29  ;;  %2223 = vrot.lane.b32.xlu2 %v2202_v38, %s2488_s16 }
 0x494   : > { %2228 = vrot.lane.b32.xlu1 %v2202_v38, %s2490_s23 }
 0x49b   : > { %2238 = vrot.lane.b32.xlu2 %v2202_v38, %s2487_s14  ;;  %2213 = vrot.lane.b32.xlu0 %v2207_v32, %s2488_s16 }
 0x49c   : > { %2233 = vrot.lane.b32.xlu1 %v2207_v32, %s2487_s14 }
 0x4a3   : > { %2243 = vrot.lane.b32.xlu2 %v2202_v38, %s2489_s17  ;;  %2218 = vrot.lane.b32.xlu0 %v2207_v32, %s2490_s23 }
 0x4a4   : > { %2253 = vrot.lane.b32.xlu1 %v2202_v38, %s2491_s26 }
 0x4ab   : > { %2258 = vrot.lane.b32.xlu2 %v2207_v32, %s2491_s26  ;;  %2248 = vrot.lane.b32.xlu0 %v2207_v32, %s2489_s17 }
 0x4ac   : > { %1138 = vperm.xlu1 %2080, %v1947_v39  }
 0x4b3   : > { %1133 = vperm.xlu2 %2141, %v1946_v40   ;;  %1143 = vperm.xlu0 %2079, %v1948_v41  }
 0x4bb   : > { %1128 = vperm.xlu0 %2079, %v1945_v42  }
 0x4ed   : > { %v2224_v43 = vpop.permute.xlu2 %2223 }
 0x4ee   : > { %v2225_v56 = vunpack.i.l.bf16 %v2224_v43  ;;  %v2226_v59 = vunpack.i.h.bf16 %v2224_v43 }
 0x4f5   : > { %v2239_v44 = vpop.permute.xlu2 %2238 }
 0x4f6   : > { %v2240_v45 = vunpack.i.l.bf16 %v2239_v44  ;;  %v2241_v46 = vunpack.i.h.bf16 %v2239_v44 }
 0x4f8   : > { %1191 = vmatpush.msrb.mxu1 %v2240_v45 }
 0x4fa   : > { %1192 = vmatpush.msrb.mxu1 %v2241_v46 }
 0x4fd   : > { %v2209_v47 = vpop.permute.xlu1 %2208  ;;  %v2244_v58 = vpop.permute.xlu2 %2243 }
 0x4fe   : > { %v2210_v52 = vunpack.i.l.bf16 %v2209_v47  ;;  %v2211_v53 = vunpack.i.h.bf16 %v2209_v47  ;;  %v2245_v62 = vunpack.i.l.bf16 %v2244_v58  ;;  %v2246_v1 = vunpack.i.h.bf16 %v2244_v58 }
 0x505   : > { %v2204_v48 = vpop.permute.xlu0 %2203  ;;  %v2259_v11 = vpop.permute.xlu2 %2258 }
 0x506   : > { %v2229_v49 = vpop.permute.xlu1 %2228  ;;  %v2205_v50 = vunpack.i.l.bf16 %v2204_v48  ;;  %v2206_v51 = vunpack.i.h.bf16 %v2204_v48  ;;  %v2260_v14 = vunpack.i.l.bf16 %v2259_v11  ;;  %v2261_v15 = vunpack.i.h.bf16 %v2259_v11 }
 0x507   : > { %v2230_v2 = vunpack.i.l.bf16 %v2229_v49  ;;  %v2231_v3 = vunpack.i.h.bf16 %v2229_v49 }
 0x508   : > { %1158 = vmatpush.msrb.mxu2 %v2205_v50 }
 0x50a   : > { %1159 = vmatpush.msrb.mxu2 %v2206_v51 }
 0x50c   : > { %1160 = vmatpush.msrb.mxu2 %v2210_v52 }
 0x50d   : > { %v2214_v54 = vpop.permute.xlu0 %2213  ;;  %v1134_v27 = vpop.permute.xlu2 %1133 }
 0x50e   : > { %v2234_v55 = vpop.permute.xlu1 %2233  ;;  %1161 = vmatpush.msrb.mxu2 %v2211_v53  ;;  %v2215_v61 = vunpack.i.l.bf16 %v2214_v54  ;;  %v2216_v63 = vunpack.i.h.bf16 %v2214_v54 }
 0x50f   : > { %v2235_v57 = vunpack.i.l.bf16 %v2234_v55  ;;  %v2236_v60 = vunpack.i.h.bf16 %v2234_v55 }
 0x510   : > { %1162 = vmatpush.msrb.mxu2 %v2225_v56 }
 0x511   : > { %1193 = vmatpush.msrb.mxu1 %v2235_v57 }
 0x512   : > { %1163 = vmatpush.msrb.mxu2 %v2226_v59 }
 0x513   : > { %1194 = vmatpush.msrb.mxu1 %v2236_v60 }
 0x514   : > { %1164 = vmatpush.msrb.mxu2 %v2215_v61 }
 0x515   : > { %1195 = vmatpush.msrb.mxu1 %v2245_v62  ;;  %v2219_v0 = vpop.permute.xlu0 %2218 }
 0x516   : > { %1165 = vmatpush.msrb.mxu2 %v2216_v63  ;;  %v2220_v4 = vunpack.i.l.bf16 %v2219_v0  ;;  %v2221_v5 = vunpack.i.h.bf16 %v2219_v0  ;;  %v2254_v8 = vpop.permute.xlu1 %2253 }
 0x517   : > { %1196 = vmatpush.msrb.mxu1 %v2246_v1  ;;  %v2255_v10 = vunpack.i.l.bf16 %v2254_v8  ;;  %v2256_v12 = vunpack.i.h.bf16 %v2254_v8  ;;  %v1966_v1 = vld [vmem:[%s2698_s11 + $0x68] sm:$0xff] }
 0x518   : > { %1166 = vmatpush.msrb.mxu2 %v2230_v2  ;;  %v1968_v2 = vld [vmem:[%s2698_s11 + $0x78] sm:$0xff] }
 0x51a   : > { %1167 = vmatpush.msrb.mxu2 %v2231_v3  ;;  %v1965_v3 = vld [vmem:[%s2698_s11 + $0x60] sm:$0xff] }
 0x51c   : > { %1168 = vmatpush.msrb.mxu2 %v2220_v4  ;;  %v1967_v4 = vld [vmem:[%s2698_s11 + $0x70] sm:$0xff] }
 0x51d   : > { %v2249_v6 = vpop.permute.xlu0 %2248 }
 0x51e   : > { %1169 = vmatpush.msrb.mxu2 %v2221_v5  ;;  %v2250_v7 = vunpack.i.l.bf16 %v2249_v6  ;;  %v2251_v9 = vunpack.i.h.bf16 %v2249_v6 }
 0x520   : > { %1949 = vmatpush.msk.msrb.mxu2 %vm608_vm2, %v2808_v33  ;;  %1197 = vmatpush.msrb.mxu1 %v2250_v7  ;;  %v1139_v33 = vpop.permute.xlu1 %1138 }
 0x522   : > { %1950 = vmatpush.msk.msrb.mxu2 %vm608_vm2, %v2811_v35  ;;  %1198 = vmatpush.msrb.mxu1 %v2251_v9 }
 0x524   : > { %1951 = vmatpush.msk.msrb.mxu2 %vm608_vm2, %v2797_v28  ;;  %1199 = vmatpush.msrb.mxu1 %v2255_v10 }
 0x525   : > { %v1144_v35 = vpop.permute.xlu0 %1143 }
 0x526   : > { %1952 = vmatpush.msk.msrb.mxu2 %vm608_vm2, %v2800_v29  ;;  %1200 = vmatpush.msrb.mxu1 %v2256_v12 }
 0x527   : > { %1174 = vmatmul.f32.vlgmr.msrb.gmra.mxu2 %v1937_v13 }
 0x528   : > { %1201 = vmatpush.msrb.mxu1 %v2260_v14 }
 0x52a   : > { %1202 = vmatpush.msrb.mxu1 %v2261_v15 }
 0x52b   : > { %1953 = vmatmul.msk.f32.vlgmr.msrb.gmra.mxu1 %vm721_vm3, %v1938_v17 }
 0x52d   : > { %v1129_v44 = vpop.permute.xlu0 %1128 }
 0x52f   : > { %1177 = vmatmul.f32.gmra.mxu2 %v1939_v18 }
 0x533   : > { %1954 = vmatmul.msk.f32.gmra.mxu1 %vm721_vm3, %v1940_v19 }
 0x537   : > { %1180 = vmatmul.f32.gmra.mxu2 %v1941_v20 }
 0x53b   : > { %1955 = vmatmul.msk.f32.gmra.mxu1 %vm721_vm3, %v1942_v21 }
 0x53f   : > { %1183 = vmatmul.f32.gmra.mxu2 %v1943_v22 }
 0x543   : > { %1956 = vmatmul.msk.f32.gmra.mxu1 %vm721_vm3, %v1944_v23 }
 0x5a8   : > { %v1204_v24 = vpop.f32.mrf.mxu1 }
 0x5aa   : > { %v1175_v25 = vpop.f32.mrf.mxu2 }
 0x5ab   : > { %v1176_v45 = vadd.f32 %v1175_v25, %v1129_v44  ;;  %v1958_v44 = vld [vmem:[%s2621_s18 + $0xc8] sm:$0xff] }
 0x5ad   : > { %v1205_v48 = vadd.f32 %v1204_v24, %v1176_v45  ;;  %v1961_v45 = vld [vmem:[%s2621_s18 + $0xe0] sm:$0xff] }
 0x5af   : > { %v1216_v50 = vmax.f32 %v1205_v48, 0.0  ;;  %v1962_v48 = vld [vmem:[%s2621_s18 + $0xe8] sm:$0xff] }
 0x5b0   : > { %v1207_v26 = vpop.f32.mrf.mxu1 }
 0x5b1   : > { %v1220_v51 = vmul.f32 %v2652_v16, %v1216_v50 }
 0x5b2   : > { %v1178_v28 = vpop.f32.mrf.mxu2 }
 0x5b3   : > { %v1179_v29 = vadd.f32 %v1178_v28, %v1134_v27 }
 0x5b5   : > { %v1208_v30 = vadd.f32 %v1207_v26, %v1179_v29 }
 0x5b7   : > { %v1217_v31 = vmax.f32 %v1208_v30, 0.0 }
 0x5b8   : > { %v1210_v32 = vpop.f32.mrf.mxu1 }
 0x5b9   : > { %v1221_v34 = vmul.f32 %v2652_v16, %v1217_v31 }
 0x5ba   : > { %v1181_v36 = vpop.f32.mrf.mxu2 }
 0x5bb   : > { %v1182_v37 = vadd.f32 %v1181_v36, %v1139_v33  ;;  %1230 = vrot.lane.b32.xlu0 %v1221_v34, %s2485_s28 }
 0x5bd   : > { %v1211_v38 = vadd.f32 %v1210_v32, %v1182_v37  ;;  %v1957_v37 = vld [vmem:[%s2621_s18 + $0xc0] sm:$0xff] }
 0x5bf   : > { %v1218_v39 = vmax.f32 %v1211_v38, 0.0 }
 0x5c0   : > { %v1213_v42 = vpop.f32.mrf.mxu1 }
 0x5c1   : > { %v1222_v40 = vmul.f32 %v2652_v16, %v1218_v39 }
 0x5c2   : > { %v1184_v41 = vpop.f32.mrf.mxu2 }
 0x5c3   : > { %v1185_v43 = vadd.f32 %v1184_v41, %v1144_v35  ;;  %1232 = vrot.lane.b32.xlu2 %v1222_v40, %s2485_s28 }
 0x5c5   : > { %v1214_v46 = vadd.f32 %v1213_v42, %v1185_v43  ;;  %v1959_v43 = vld [vmem:[%s2621_s18 + $0xd0] sm:$0xff] }
 0x5c7   : > { %v1219_v47 = vmax.f32 %v1214_v46, 0.0  ;;  %v1960_v46 = vld [vmem:[%s2621_s18 + $0xd8] sm:$0xff] }
 0x5c9   : > { %v1223_v49 = vmul.f32 %v2652_v16, %v1219_v47  ;;  %v1963_v47 = vld [vmem:[%s2621_s18 + $0xf0] sm:$0xff] }
 0x5cb   : > { %1234 = vrot.lane.b32.xlu1 %v1223_v49, %s2485_s28  ;;  %v1964_v49 = vld [vmem:[%s2621_s18 + $0xf8] sm:$0xff] }
 0x5d3   : > { %1228 = vrot.lane.b32.xlu1 %v1220_v51, %s2485_s28 }
 0x61d   : > { %v1233_v52 = vpop.permute.xlu2 %1232 }
 0x61e   : > { %v2861_v53 = vsel %vm603_vm1, 0.0, %v1233_v52 }
 0x61f   : > { %v1246_v56 = vsel %vm608_vm2, %v2861_v53, 0.0 }
 0x62d   : > { %v1231_v59 = vpop.permute.xlu0 %1230 }
 0x62e   : > { %v2873_v16 = vsel %vm603_vm1, 0.0, %v1231_v59  ;;  %v2917_v59 = vld [vmem:[%s2639_s19] ss:$0 sm:$0xff]  ;;  %s1903_s19 = sshll.u32 %s2629_s21, 3 }
 0x62f   : > { %v1245_v62 = vsel %vm608_vm2, %v2873_v16, 0.0 }
 0x63d   : > { %v1235_v54 = vpop.permute.xlu1 %1234 }
 0x63e   : > { %v2864_v55 = vsel %vm603_vm1, 0.0, %v1235_v54 }
 0x63f   : > { %v1247_v57 = vsel %vm608_vm2, %v2864_v55, 0.0 }
 0x640   : > { %v2262_v58 = vpack.i.bf16 %v1246_v56, %v1247_v57 }
 0x642   : > { %2263 = vrot.lane.b32.xlu2 %v2262_v58, %s2486_s29  ;;  %2283 = vrot.lane.b32.xlu1 %v2262_v58, %s2488_s16 }
 0x645   : > { %v1229_v60 = vpop.permute.xlu1 %1228 }
 0x646   : > { %v2876_v61 = vsel %vm603_vm1, 0.0, %v1229_v60 }
 0x647   : > { %v1244_v63 = vsel %vm608_vm2, %v2876_v61, 0.0 }
 0x648   : > { %v2272_v0 = vpack.i.bf16 %v1244_v63, %v1245_v62 }
 0x64a   : > { %2298 = vrot.lane.b32.xlu1 %v2262_v58, %s2487_s14  ;;  %2273 = vrot.lane.b32.xlu2 %v2272_v0, %s2488_s16 }
 0x64b   : > { %2268 = vrot.lane.b32.xlu0 %v2272_v0, %s2486_s29 }
 0x652   : > { %2303 = vrot.lane.b32.xlu1 %v2262_v58, %s2489_s17  ;;  %2278 = vrot.lane.b32.xlu2 %v2272_v0, %s2490_s23 }
 0x653   : > { %2288 = vrot.lane.b32.xlu0 %v2262_v58, %s2490_s23 }
 0x65a   : > { %2318 = vrot.lane.b32.xlu1 %v2272_v0, %s2491_s26  ;;  %2308 = vrot.lane.b32.xlu2 %v2272_v0, %s2489_s17 }
 0x65b   : > { %2293 = vrot.lane.b32.xlu0 %v2272_v0, %s2487_s14 }
 0x662   : > { %1345 = vperm.xlu1 %2080, %v1966_v1   ;;  %1355 = vperm.xlu2 %2141, %v1968_v2  }
 0x663   : > { %2313 = vrot.lane.b32.xlu0 %v2262_v58, %s2491_s26 }
 0x66a   : > { %1340 = vperm.xlu2 %2141, %v1965_v3  }
 0x66b   : > { %1350 = vperm.xlu0 %2079, %v1967_v4  }
 0x69c   : > { %v2264_v5 = vpop.permute.xlu2 %2263 }
 0x69d   : > { %v2265_v6 = vunpack.i.l.bf16 %v2264_v5  ;;  %v2266_v7 = vunpack.i.h.bf16 %v2264_v5 }
 0x69f   : > { %1370 = vmatpush.msrb.mxu3 %v2265_v6 }
 0x6a1   : > { %1371 = vmatpush.msrb.mxu3 %v2266_v7 }
 0x6a4   : > { %v2274_v13 = vpop.permute.xlu2 %2273 }
 0x6a5   : > { %v2275_v20 = vunpack.i.l.bf16 %v2274_v13  ;;  %v2276_v21 = vunpack.i.h.bf16 %v2274_v13 }
 0x6ac   : > { %v2279_v22 = vpop.permute.xlu2 %2278 }
 0x6ad   : > { %v2280_v27 = vunpack.i.l.bf16 %v2279_v22  ;;  %v2281_v30 = vunpack.i.h.bf16 %v2279_v22 }
 0x6b4   : > { %v2284_v8 = vpop.permute.xlu1 %2283  ;;  %v2309_v32 = vpop.permute.xlu2 %2308 }
 0x6b5   : > { %v2285_v17 = vunpack.i.l.bf16 %v2284_v8  ;;  %v2286_v18 = vunpack.i.h.bf16 %v2284_v8  ;;  %v2310_v34 = vunpack.i.l.bf16 %v2309_v32  ;;  %v2311_v36 = vunpack.i.h.bf16 %v2309_v32  ;;  %v1987_v32 = vld [vmem:[%s2698_s11 + $0x90] sm:$0xff] }
 0x6bc   : > { %v2299_v9 = vpop.permute.xlu1 %2298  ;;  %v1356_v58 = vpop.permute.xlu2 %1355 }
 0x6bd   : > { %v2269_v10 = vpop.permute.xlu0 %2268  ;;  %v2300_v11 = vunpack.i.l.bf16 %v2299_v9  ;;  %v2301_v14 = vunpack.i.h.bf16 %v2299_v9 }
 0x6be   : > { %v2270_v12 = vunpack.i.l.bf16 %v2269_v10  ;;  %v2271_v15 = vunpack.i.h.bf16 %v2269_v10 }
 0x6bf   : > { %1403 = vmatpush.msra.mxu0 %v2300_v11 }
 0x6c0   : > { %1372 = vmatpush.msrb.mxu3 %v2270_v12 }
 0x6c1   : > { %1404 = vmatpush.msra.mxu0 %v2301_v14 }
 0x6c2   : > { %1373 = vmatpush.msrb.mxu3 %v2271_v15 }
 0x6c4   : > { %1374 = vmatpush.msrb.mxu3 %v2285_v17  ;;  %v2304_v28 = vpop.permute.xlu1 %2303  ;;  %v1341_v5 = vpop.permute.xlu2 %1340 }
 0x6c5   : > { %v2289_v19 = vpop.permute.xlu0 %2288  ;;  %v2305_v31 = vunpack.i.l.bf16 %v2304_v28  ;;  %v2306_v33 = vunpack.i.h.bf16 %v2304_v28 }
 0x6c6   : > { %1375 = vmatpush.msrb.mxu3 %v2286_v18  ;;  %v2290_v23 = vunpack.i.l.bf16 %v2289_v19  ;;  %v2291_v24 = vunpack.i.h.bf16 %v2289_v19 }
 0x6c8   : > { %1376 = vmatpush.msrb.mxu3 %v2275_v20 }
 0x6ca   : > { %1377 = vmatpush.msrb.mxu3 %v2276_v21 }
 0x6cc   : > { %1378 = vmatpush.msrb.mxu3 %v2290_v23  ;;  %v2319_v39 = vpop.permute.xlu1 %2318 }
 0x6cd   : > { %v2294_v25 = vpop.permute.xlu0 %2293  ;;  %v2320_v41 = vunpack.i.l.bf16 %v2319_v39  ;;  %v2321_v42 = vunpack.i.h.bf16 %v2319_v39 }
 0x6ce   : > { %v2295_v26 = vunpack.i.l.bf16 %v2294_v25  ;;  %1379 = vmatpush.msrb.mxu3 %v2291_v24  ;;  %v2296_v29 = vunpack.i.h.bf16 %v2294_v25 }
 0x6d0   : > { %1380 = vmatpush.msrb.mxu3 %v2280_v27  ;;  %1405 = vmatpush.msra.mxu0 %v2295_v26 }
 0x6d2   : > { %1381 = vmatpush.msrb.mxu3 %v2281_v30  ;;  %1406 = vmatpush.msra.mxu0 %v2296_v29  ;;  %v1986_v29 = vld [vmem:[%s2698_s11 + $0x88] sm:$0xff]  ;;  %v1988_v30 = vld [vmem:[%s2698_s11 + $0x98] sm:$0xff] }
 0x6d4   : > { %1969 = vmatpush.msk.msrb.mxu3 %vm608_vm2, %v2864_v55  ;;  %1407 = vmatpush.msra.mxu0 %v2305_v31  ;;  %v1346_v52 = vpop.permute.xlu1 %1345  ;;  %v1985_v31 = vld [vmem:[%s2698_s11 + $0x80] sm:$0xff] }
 0x6d5   : > { %v2314_v35 = vpop.permute.xlu0 %2313 }
 0x6d6   : > { %1970 = vmatpush.msk.msrb.mxu3 %vm608_vm2, %v2861_v53  ;;  %1408 = vmatpush.msra.mxu0 %v2306_v33  ;;  %v2315_v38 = vunpack.i.l.bf16 %v2314_v35  ;;  %v2316_v40 = vunpack.i.h.bf16 %v2314_v35 }
 0x6d8   : > { %1971 = vmatpush.msk.msrb.mxu3 %vm608_vm2, %v2873_v16  ;;  %1409 = vmatpush.msra.mxu0 %v2310_v34 }
 0x6da   : > { %1972 = vmatpush.msk.msrb.mxu3 %vm608_vm2, %v2876_v61  ;;  %1410 = vmatpush.msra.mxu0 %v2311_v36 }
 0x6db   : > { %1386 = vmatmul.f32.vlgmr.msrb.gmra.mxu3 %v1957_v37 }
 0x6dc   : > { %1411 = vmatpush.msra.mxu0 %v2315_v38 }
 0x6dd   : > { %v1351_v60 = vpop.permute.xlu0 %1350 }
 0x6de   : > { %1412 = vmatpush.msra.mxu0 %v2316_v40 }
 0x6e0   : > { %1413 = vmatpush.msra.mxu0 %v2320_v41 }
 0x6e2   : > { %1414 = vmatpush.msra.mxu0 %v2321_v42 }
 0x6e3   : > { %1389 = vmatmul.f32.gmra.mxu3 %v1959_v43  ;;  %1973 = vmatmul.msk.f32.vlgmr.msra.gmra.mxu0 %vm721_vm3, %v1958_v44 }
 0x6eb   : > { %1392 = vmatmul.f32.gmra.mxu3 %v1961_v45  ;;  %1974 = vmatmul.msk.f32.gmra.mxu0 %vm721_vm3, %v1960_v46 }
 0x6f3   : > { %1395 = vmatmul.f32.gmra.mxu3 %v1963_v47  ;;  %1975 = vmatmul.msk.f32.gmra.mxu0 %vm721_vm3, %v1962_v48 }
 0x6fb   : > { %1976 = vmatmul.msk.f32.gmra.mxu0 %vm721_vm3, %v1964_v49 }
 0x75e   : > { %v1387_v50 = vpop.f32.mrf.mxu3 }
 0x75f   : > { %v1388_v7 = vadd.f32 %v1387_v50, %v1341_v5 }
 0x760   : > { %v1416_v51 = vpop.f32.mrf.mxu0 }
 0x761   : > { %v1417_v10 = vadd.f32 %v1416_v51, %v1388_v7  ;;  %v1979_v7 = vld [vmem:[%s2621_s18 + $0x110] sm:$0xff] }
 0x763   : > { %v1428_v12 = vmax.f32 %v1417_v10, 0.0  ;;  %v1981_v10 = vld [vmem:[%s2621_s18 + $0x120] sm:$0xff] }
 0x765   : > { %v1432_v13 = vmul.f32 %v2917_v59, %v1428_v12  ;;  %v1983_v12 = vld [vmem:[%s2621_s18 + $0x130] sm:$0xff] }
 0x766   : > { %v1390_v53 = vpop.f32.mrf.mxu3 }
 0x767   : > { %v1391_v54 = vadd.f32 %v1390_v53, %v1346_v52 }
 0x768   : > { %v1419_v55 = vpop.f32.mrf.mxu0 }
 0x769   : > { %v1420_v56 = vadd.f32 %v1419_v55, %v1391_v54 }
 0x76b   : > { %v1429_v57 = vmax.f32 %v1420_v56, 0.0 }
 0x76d   : > { %v1433_v16 = vmul.f32 %v2917_v59, %v1429_v57 }
 0x76e   : > { %v1393_v61 = vpop.f32.mrf.mxu3 }
 0x76f   : > { %v1394_v62 = vadd.f32 %v1393_v61, %v1351_v60  ;;  %1442 = vrot.lane.b32.xlu2 %v1433_v16, %s2485_s28 }
 0x770   : > { %v1422_v63 = vpop.f32.mrf.mxu0 }
 0x771   : > { %v1423_v0 = vadd.f32 %v1422_v63, %v1394_v62 }
 0x773   : > { %v1430_v1 = vmax.f32 %v1423_v0, 0.0 }
 0x775   : > { %v1434_v2 = vmul.f32 %v2917_v59, %v1430_v1  ;;  %v1977_v1 = vld [vmem:[%s2621_s18 + $0x100] sm:$0xff] }
 0x776   : > { %v1396_v3 = vpop.f32.mrf.mxu3 }
 0x777   : > { %v1397_v4 = vadd.f32 %v1396_v3, %v1356_v58  ;;  %1444 = vrot.lane.b32.xlu1 %v1434_v2, %s2485_s28 }
 0x778   : > { %v1425_v6 = vpop.f32.mrf.mxu0 }
 0x779   : > { %v1426_v8 = vadd.f32 %v1425_v6, %v1397_v4 }
 0x77b   : > { %v1431_v9 = vmax.f32 %v1426_v8, 0.0  ;;  %v1978_v8 = vld [vmem:[%s2621_s18 + $0x108] sm:$0xff] }
 0x77d   : > { %v1435_v11 = vmul.f32 %v2917_v59, %v1431_v9  ;;  %v1984_v9 = vld [vmem:[%s2621_s18 + $0x138] sm:$0xff] }
 0x77f   : > { %1446 = vrot.lane.b32.xlu0 %v1435_v11, %s2485_s28  ;;  %v1980_v11 = vld [vmem:[%s2621_s18 + $0x118] sm:$0xff] }
 0x787   : > { %1440 = vrot.lane.b32.xlu0 %v1432_v13, %s2485_s28  ;;  %v1982_v13 = vld [vmem:[%s2621_s18 + $0x128] sm:$0xff]  ;;  %s2434_s18 = scalar_lea.hbm %s3054_s9, 24 }
 0x7c9   : > { %v1443_v22 = vpop.permute.xlu2 %1442 }
 0x7ca   : > { %v2940_v23 = vsel %vm603_vm1, 0.0, %v1443_v22 }
 0x7cb   : > { %v1457_v26 = vsel %vm608_vm2, %v2940_v23, 0.0 }
 0x7e9   : > { %v1445_v14 = vpop.permute.xlu1 %1444 }
 0x7ea   : > { %v2928_v15 = vsel %vm603_vm1, 0.0, %v1445_v14 }
 0x7eb   : > { %v1458_v19 = vsel %vm608_vm2, %v2928_v15, 0.0 }
 0x7f1   : > { %v1447_v17 = vpop.permute.xlu0 %1446 }
 0x7f2   : > { %v2931_v18 = vsel %vm603_vm1, 0.0, %v1447_v17 }
 0x7f3   : > { %v1459_v20 = vsel %vm608_vm2, %v2931_v18, 0.0 }
 0x7f4   : > { %v2322_v21 = vpack.i.bf16 %v1458_v19, %v1459_v20 }
 0x7f6   : > { %2323 = vrot.lane.b32.xlu1 %v2322_v21, %s2486_s29  ;;  %2333 = vrot.lane.b32.xlu0 %v2322_v21, %s2488_s16 }
 0x7f9   : > { %v1441_v24 = vpop.permute.xlu0 %1440 }
 0x7fa   : > { %v2943_v25 = vsel %vm603_vm1, 0.0, %v1441_v24 }
 0x7fb   : > { %v1456_v27 = vsel %vm608_vm2, %v2943_v25, 0.0 }
 0x7fc   : > { %v2347_v28 = vpack.i.bf16 %v1456_v27, %v1457_v26 }
 0x7fe   : > { %2348 = vrot.lane.b32.xlu0 %v2347_v28, %s2490_s23  ;;  %2338 = vrot.lane.b32.xlu1 %v2347_v28, %s2488_s16 }
 0x7ff   : > { %2328 = vrot.lane.b32.xlu2 %v2347_v28, %s2486_s29  ;;  %s500_s29 = scalar_lea.vmem %s3053_s8, %s1903_s19 }
 0x800   : > { %v1649_v33 = vld [vmem:[%s500_s29] sm:$0xff] }
 0x806   : > { %2363 = vrot.lane.b32.xlu0 %v2322_v21, %s2489_s17  ;;  %2353 = vrot.lane.b32.xlu1 %v2322_v21, %s2487_s14 }
 0x807   : > { %2343 = vrot.lane.b32.xlu2 %v2322_v21, %s2490_s23 }
 0x80e   : > { %2378 = vrot.lane.b32.xlu0 %v2347_v28, %s2491_s26  ;;  %2368 = vrot.lane.b32.xlu1 %v2347_v28, %s2489_s17 }
 0x80f   : > { %2358 = vrot.lane.b32.xlu2 %v2347_v28, %s2487_s14  ;;  %s2021_s14 = smul.u32 56, %s2629_s21  ;;  %s1894_s21 = sshll.u32 %s2617_s27, 3 }
 0x810   : > { %s464_s15 = scalar_lea.vmem [#allocation5], %s1894_s21 }
 0x811   : > { %s2993_s23 = scalar_lea.vmem %s3047_s2, %s2021_s14  ;;  %s1723_s28 = sshll.u32 %s464_s15, 4  ;;  %s1724_s28 = int_to_ptr.vmem [resolvable:$true] %s1723_s28 }
 0x812   : > { %v1683_v19 = vld [vmem:[%s2993_s23 + $0x28] sm:$0xff]  ;;  %v1682_v20 = vld [vmem:[%s2993_s23 + $0x20] sm:$0xff]  ;;  %v1681_v22 = vld [vmem:[%s2993_s23 + $0x18] sm:$0xff]  ;;  %s1711_s14 = scalar_lea.sflag [#allocation4], %s2617_s27 }
 0x813   : > { %v1680_v24 = vld [vmem:[%s2993_s23 + $0x10] sm:$0xff] }
 0x816   : > { %1557 = vperm.xlu0 %2079, %v1986_v29   ;;  %1567 = vperm.xlu1 %2080, %v1988_v30  }
 0x817   : > { %2373 = vrot.lane.b32.xlu2 %v2322_v21, %s2491_s26  ;;  %s496_s26 = scalar_lea.vmem %s3052_s7, %s1903_s19  ;;  %s1721_s19 = scalar_lea.hbm %s3054_s9, %s2000_s22 }
 0x818   : > { %s1725_s29 = sshll.u32 %s1721_s19, 4  ;;  %s1726_s29 = int_to_ptr.hbm [resolvable:$true] %s1725_s29 }
 0x819   : > { %s2428_s16 = sshra.s32 %s1726_s29, 4  ;;  %s2429_s16 = int_to_ptr.hbm [resolvable:$true] %s2428_s16 }
 0x81a   : > { %s2430_s17 = scalar_lea.hbm %s2429_s16, 8  ;;  %p2435_p2 = scmp.lt.s32.totalorder %s2429_s16, %s3054_s9 }
 0x81b   : > { %p2431_p6 = scmp.ne.s32.totalorder %s2429_s16, %s2430_s17  ;;  %p2436_p3 = scmp.lt.s32.totalorder %s2434_s18, %s2430_s17 }
 0x81d   : > { %p2432_p0 = pnand %p2431_p6, %p2587_p10  ;;  %p2437_p4 = por %p2436_p3, %p2435_p2 }
 0x81e   : > { %1552 = vperm.xlu1 %2080, %v1985_v31  }
 0x81f   : > { %1562 = vperm.xlu2 %2141, %v1987_v32   ;;  %p2433_p1 = pneg %p2432_p0 }
 0x821   : > { %p2438_p5 = pnand %p2437_p4, %p2433_p1 }
 0x827   : > { %1652 = vperm.xlu2 %2141, %v1649_v33  }
 0x859   : > { %v2329_v34 = vpop.permute.xlu2 %2328 }
 0x85a   : > { %v2330_v39 = vunpack.i.l.bf16 %v2329_v34  ;;  %v2331_v40 = vunpack.i.h.bf16 %v2329_v34 }
 0x861   : > { %v2344_v41 = vpop.permute.xlu2 %2343 }
 0x862   : > { %v2345_v49 = vunpack.i.l.bf16 %v2344_v41  ;;  %v2346_v52 = vunpack.i.h.bf16 %v2344_v41 }
 0x868   : > { %v2324_v35 = vpop.permute.xlu1 %2323  ;;  %v2334_v37 = vpop.permute.xlu0 %2333 }
 0x869   : > { %v2325_v36 = vunpack.i.l.bf16 %v2324_v35  ;;  %v2326_v38 = vunpack.i.h.bf16 %v2324_v35  ;;  %v2335_v43 = vunpack.i.l.bf16 %v2334_v37  ;;  %v2336_v44 = vunpack.i.h.bf16 %v2334_v37  ;;  %v2359_v51 = vpop.permute.xlu2 %2358 }
 0x86a   : > { %v2360_v54 = vunpack.i.l.bf16 %v2359_v51  ;;  %v2361_v57 = vunpack.i.h.bf16 %v2359_v51 }
 0x86b   : > { %1582 = vmatpush.msra.mxu2 %v2325_v36 }
 0x86d   : > { %1583 = vmatpush.msra.mxu2 %v2326_v38 }
 0x86f   : > { %1584 = vmatpush.msra.mxu2 %v2330_v39 }
 0x870   : > { %v2339_v42 = vpop.permute.xlu1 %2338  ;;  %v2349_v45 = vpop.permute.xlu0 %2348 }
 0x871   : > { %1585 = vmatpush.msra.mxu2 %v2331_v40  ;;  %v2340_v46 = vunpack.i.l.bf16 %v2339_v42  ;;  %v2341_v47 = vunpack.i.h.bf16 %v2339_v42  ;;  %v2350_v55 = vunpack.i.l.bf16 %v2349_v45  ;;  %v2351_v58 = vunpack.i.h.bf16 %v2349_v45  ;;  %v2374_v63 = vpop.permute.xlu2 %2373 }
 0x872   : > { %v2375_v2 = vunpack.i.l.bf16 %v2374_v63  ;;  %v2376_v4 = vunpack.i.h.bf16 %v2374_v63 }
 0x873   : > { %1586 = vmatpush.msra.mxu2 %v2335_v43 }
 0x875   : > { %1587 = vmatpush.msra.mxu2 %v2336_v44 }
 0x877   : > { %1588 = vmatpush.msra.mxu2 %v2340_v46 }
 0x878   : > { %v2354_v48 = vpop.permute.xlu1 %2353  ;;  %v2364_v56 = vpop.permute.xlu0 %2363 }
 0x879   : > { %v2355_v50 = vunpack.i.l.bf16 %v2354_v48  ;;  %1589 = vmatpush.msra.mxu2 %v2341_v47  ;;  %v2356_v53 = vunpack.i.h.bf16 %v2354_v48  ;;  %v2365_v16 = vunpack.i.l.bf16 %v2364_v56  ;;  %v2366_v61 = vunpack.i.h.bf16 %v2364_v56  ;;  %v1563_v26 = vpop.permute.xlu2 %1562  ;;  %v1648_v48 = vld [vmem:[%s496_s26] sm:$0xff] }
 0x87b   : > { %1590 = vmatpush.msra.mxu2 %v2345_v49  ;;  %1615 = vmatpush.msra.mxu1 %v2355_v50  ;;  %v1679_v49 = vld [vmem:[%s2993_s23 + $0x8] sm:$0xff] }
 0x87c   : > { %2006 = vmatpush.msra.mxu3 %v2355_v50  ;;  %v1678_v50 = vld [vmem:[%s2993_s23] sm:$0xff] }
 0x87d   : > { %1591 = vmatpush.msra.mxu2 %v2346_v52  ;;  %1616 = vmatpush.msra.mxu1 %v2356_v53 }
 0x87e   : > { %2007 = vmatpush.msra.mxu3 %v2356_v53 }
 0x87f   : > { %1592 = vmatpush.msra.mxu2 %v2350_v55  ;;  %1617 = vmatpush.msra.mxu1 %v2360_v54 }
 0x880   : > { %2008 = vmatpush.msra.mxu3 %v2360_v54  ;;  %v2369_v60 = vpop.permute.xlu1 %2368  ;;  %v2379_v3 = vpop.permute.xlu0 %2378 }
 0x881   : > { %1593 = vmatpush.msra.mxu2 %v2351_v58  ;;  %1618 = vmatpush.msra.mxu1 %v2361_v57  ;;  %v2370_v62 = vunpack.i.l.bf16 %v2369_v60  ;;  %v2371_v0 = vunpack.i.h.bf16 %v2369_v60  ;;  %v2380_v5 = vunpack.i.l.bf16 %v2379_v3  ;;  %v2381_v6 = vunpack.i.h.bf16 %v2379_v3  ;;  %v1653_v51 = vpop.permute.xlu2 %1652 }
 0x882   : > { %2009 = vmatpush.msra.mxu3 %v2361_v57 }
 0x883   : > { %1989 = vmatpush.msk.msra.mxu2 %vm608_vm2, %v2931_v18  ;;  %1619 = vmatpush.msra.mxu1 %v2365_v16  ;;  %v1684_v18 = vld [vmem:[%s2993_s23 + $0x30] sm:$0xff] }
 0x884   : > { %2010 = vmatpush.msra.mxu3 %v2365_v16  ;;  %1698 = vmatpush.msrb.mxu0 %v1684_v18 }
 0x885   : > { %1990 = vmatpush.msk.msra.mxu2 %vm608_vm2, %v2928_v15  ;;  %1620 = vmatpush.msra.mxu1 %v2366_v61 }
 0x886   : > { %2011 = vmatpush.msra.mxu3 %v2366_v61  ;;  %1699 = vmatpush.msrb.mxu0 %v1683_v19 }
 0x887   : > { %1991 = vmatpush.msk.msra.mxu2 %vm608_vm2, %v2940_v23  ;;  %1621 = vmatpush.msra.mxu1 %v2370_v62 }
 0x888   : > { %2012 = vmatpush.msra.mxu3 %v2370_v62  ;;  %v1568_v23 = vpop.permute.xlu1 %1567  ;;  %1700 = vmatpush.msrb.mxu0 %v1682_v20  ;;  %v1558_v28 = vpop.permute.xlu0 %1557 }
 0x889   : > { %1992 = vmatpush.msk.msra.mxu2 %vm608_vm2, %v2943_v25  ;;  %1622 = vmatpush.msra.mxu1 %v2371_v0 }
 0x88a   : > { %2013 = vmatpush.msra.mxu3 %v2371_v0  ;;  %1598 = vmatmul.f32.vlgmr.msra.gmra.mxu2 %v1977_v1 }
 0x88b   : > { %1623 = vmatpush.msra.mxu1 %v2375_v2  ;;  %1701 = vmatpush.msrb.mxu0 %v1681_v22 }
 0x88c   : > { %2014 = vmatpush.msra.mxu3 %v2375_v2 }
 0x88d   : > { %1624 = vmatpush.msra.mxu1 %v2376_v4  ;;  %1702 = vmatpush.msrb.mxu0 %v1680_v24 }
 0x88e   : > { %2015 = vmatpush.msra.mxu3 %v2376_v4 }
 0x88f   : > { %1625 = vmatpush.msra.mxu1 %v2380_v5  ;;  %1703 = vmatpush.msrb.mxu0 %v1679_v49 }
 0x890   : > { %2016 = vmatpush.msra.mxu3 %v2380_v5  ;;  %v1553_v30 = vpop.permute.xlu1 %1552 }
 0x891   : > { %1626 = vmatpush.msra.mxu1 %v2381_v6  ;;  %1704 = vmatpush.msrb.mxu0 %v1678_v50 }
 0x892   : > { %2017 = vmatpush.msra.mxu3 %v2381_v6  ;;  %1601 = vmatmul.f32.gmra.mxu2 %v1979_v7 }
 0x893   : > { %1993 = vmatmul.msk.f32.vlgmr.msra.gmra.mxu1 %vm721_vm3, %v1978_v8  ;;  %1996 = vmatmul.msk.f32.vlgmr.msra.gmra.mxu3 %vm721_vm3, %v1984_v9 }
 0x89a   : > { %1604 = vmatmul.f32.gmra.mxu2 %v1981_v10 }
 0x89b   : > { %1994 = vmatmul.msk.f32.gmra.mxu1 %vm721_vm3, %v1980_v11 }
 0x8a2   : > { %1607 = vmatmul.f32.gmra.mxu2 %v1983_v12 }
 0x8a3   : > { %1995 = vmatmul.msk.f32.gmra.mxu1 %vm721_vm3, %v1982_v13 }
 0x90d   : > { %v1599_v14 = vpop.f32.mrf.mxu2 }
 0x90e   : > { %v1600_v34 = vadd.f32 %v1599_v14, %v1553_v30 }
 0x910   : > { %v1628_v15 = vpop.f32.mrf.mxu1 }
 0x911   : > { %v1629_v39 = vadd.f32 %v1628_v15, %v1600_v34 }
 0x913   : > { %v1640_v44 = vmax.f32 %v1629_v39, 0.0 }
 0x915   : > { %v1602_v17 = vpop.f32.mrf.mxu2  ;;  %v1644_v47 = vmul.f32 %v2917_v59, %v1640_v44 }
 0x916   : > { %v1603_v31 = vadd.f32 %v1602_v17, %v1558_v28  ;;  %v1637_v33 = vpop.f32.mrf.mxu3 }
 0x918   : > { %v1631_v21 = vpop.f32.mrf.mxu1 }
 0x919   : > { %v1632_v37 = vadd.f32 %v1631_v21, %v1603_v31 }
 0x91b   : > { %v1641_v42 = vmax.f32 %v1632_v37, 0.0 }
 0x91d   : > { %v1605_v25 = vpop.f32.mrf.mxu2  ;;  %v1645_v46 = vmul.f32 %v2917_v59, %v1641_v42 }
 0x91e   : > { %v1606_v27 = vadd.f32 %v1605_v25, %v1563_v26 }
 0x920   : > { %v1634_v29 = vpop.f32.mrf.mxu1 }
 0x921   : > { %v1635_v35 = vadd.f32 %v1634_v29, %v1606_v27 }
 0x923   : > { %v1642_v40 = vmax.f32 %v1635_v35, 0.0 }
 0x925   : > { %v1608_v32 = vpop.f32.mrf.mxu2  ;;  %v1646_v45 = vmul.f32 %v2917_v59, %v1642_v40 }
 0x926   : > { %v1609_v36 = vadd.f32 %v1608_v32, %v1568_v23 }
 0x928   : > { %v1638_v38 = vadd.f32 %v1637_v33, %v1609_v36 }
 0x92a   : > { %v1643_v41 = vmax.f32 %v1638_v38, 0.0 }
 0x92c   : > { %v1647_v43 = vmul.f32 %v2917_v59, %v1643_v41 }
 0x92e   : > { %1670 = vmatpush.msrb.mxu3 %v1647_v43 }
 0x930   : > { %1671 = vmatpush.msrb.mxu3 %v1646_v45 }
 0x932   : > { %1672 = vmatpush.msrb.mxu3 %v1645_v46 }
 0x934   : > { %1673 = vmatpush.msrb.mxu3 %v1644_v47 }
 0x935   : > { %1997 = vmatmul.msk.f32.vlgmr.msrb.gmra.mxu3 %vm534_vm0, %v1648_v48 }
 0x9b8   : > { %v1675_v52 = vpop.f32.mrf.mxu3 }
 0x9b9   : > { %v1676_v53 = vadd.f32 %v1675_v52, %v1653_v51 }
 0x9bb   : > { %1998 = vmatmul.msk.f32.vlgmr.msrb.gmra.mxu0 %vm1685_vm4, %v1676_v53 }
 0xa38   : > { %v1706_v59 = vpop.f32.mrf.mxu0 }
 0xa39   : > { %1709 = vst [vmem:[%s464_s15] sm:$0xff] %v1706_v59 }
 0xa3a   : > { %2441 = shalt.err (!%p2438_p5)
}
 0xa3b   : > { %2025 = dma.vmem_to_hbm [thread:$0]  (%p2587_p10), %s1724_s28, 128, %s1726_s29, %s1711_s14  }
 0xa3c PF: > { %p2036_p7 = scmp.ge.s32.totalorder %s2480_s12, 2  ;;  %s1737_s21 = sand.u32 1, %s2468_s30  }
 0xa3d   : > { %s1738_s22 = scalar_lea.sflag [#allocation4], %s1737_s21 }
 0xa3e   : > { %p2032_p8 = pnand %p2036_p7, %p2591_p11 }
 0xa40   : > { %p2033_p9 = pneg %p2032_p8 }
 0xa42   : > { %2463 = dma.done.wait (%p2033_p9), %s1738_s22, 128  }
 0xa43   : > { %2465 = vsyncadd (%p2033_p9), %s1738_s22, 4294967168  ;;  %s3068_s12 = sld [smem:[#allocation9_spill]]  ;;  %s3071_s30 = smov %s2472_s10 }
 0xa44   : > { %s3069_s24 = sld [smem:[#allocation8_spill]] }
 0xa45   : > { %s3070_s11 = sld [smem:[#allocation10_spill]] }
 0xa49   : > { %p22_p13 = scmp.ge.s32.totalorder %s3068_s12, 5  }
 0xa4a   : > { %s3072_s10 = smov %s3069_s24 }
 0xa4b   :  { %24 = sbr.rel (!%p22_p13) target bundleno = 5 (0x5), region = 133 }
 0xa50   :  { %1744 = vsyncpa [#allocation3], 1 }
 0xa51   :  { %1746 = vsyncpa [#allocation3 + $0x1], 1 }
 0xa52   :  { %1747 = vsyncpa [#allocation4], 1 }
 0xa53   :  { %1749 = vsyncpa [#allocation4 + $0x1], 1 }

</bundles_post_ra>
